<compile_context>
chip_gen: v5e
topology: v5e:2x2
jax: 0.10.0
libtpu: 0.0.40
codegen_flags: <defaults>
</compile_context>

<pallas_src>
import functools

import jax
import jax.numpy as jnp
import numpy as np
from jax import lax
from jax.experimental import pallas as pl
from jax.experimental.pallas import tpu as pltpu


def _upsample_scatter(H1, W1):
    """0/1 matrices S[k] (H1*W1, H*W): tap k=kh*2+kw scattered to (2i+kh, 2j+kw)."""
    H, W = 2 * H1, 2 * W1
    S = np.zeros((4, H1 * W1, H * W), np.float32)
    for kh in range(2):
        for kw in range(2):
            k = kh * 2 + kw
            for i in range(H1):
                for j in range(W1):
                    S[k, i * W1 + j, (2 * i + kh) * W + (2 * j + kw)] = 1.0
    return jnp.asarray(S)


def _col_masks(H, W):
    """Row 0: zero at w==0 (for dw=-1).  Row 1: zero at w==W-1 (for dw=+1)."""
    m = np.ones((2, H * W), np.float32)
    m[0].reshape(H, W)[:, 0] = 0.0
    m[1].reshape(H, W)[:, W - 1] = 0.0
    return jnp.asarray(m)


def up_kernel(x1_ref, x2_ref, wt_ref, scat_ref, bt_ref,
              w1s_ref, w1u_ref, b1_ref, w2_ref, b2_ref, cmask_ref,
              o_ref, *, H1, W1):
    """One grid step = the full Up forward for one batch element.

    x1_ref   : (1, Cin, H1*W1)   low-res input (channel-major, flat HW)
    x2_ref   : (1, Cskip, H*W)   skip connection
    wt_ref   : (4*Cup, Cin)      deconv taps, row = (kh*2+kw)*Cup + co
    scat_ref : (4, H1*W1, H*W)   constant 0/1 upsample-scatter matrices
    bt_ref   : (Cup, 1)
    w1s_ref  : (9, Cout1, Cskip) conv1 weights acting on the skip channels
    w1u_ref  : (9, Cout1, Cup)   conv1 weights acting on the upsampled channels
    b1_ref   : (Cout1, 1)
    w2_ref   : (9, Cout, Cout1)  conv2 weights
    b2_ref   : (Cout, 1)
    cmask_ref: (2, H*W)          0/1 column-validity masks for dw = -1 / +1
    o_ref    : (1, Cout, H*W)    channel-major (== NCHW) output, lane-dense
    """
    f32 = jnp.float32
    H, W = 2 * H1, 2 * W1
    HW = H * W
    Cup = bt_ref.shape[0]
    pad = W + 1  # covers the largest flat shift |dh*W + dw| = W + 1

    cm = cmask_ref[...]
    cm_neg = cm[0:1, :]          # mask for taps reading w-1
    cm_pos = cm[1:2, :]          # mask for taps reading w+1

    def zero_extend(v):
        z = jnp.zeros((v.shape[0], pad), v.dtype)
        return jnp.concatenate([z, v, z], axis=1)          # (C, HW + 2*pad)

    def shifted(vp, dh, dw):
        # vp is zero_extend(x); returns y with y[:, h*W+w] = x[:, (h+dh)*W+(w+dw)]
        # (zero outside the image).  Vertical OOB is covered by the zero pad;
        # horizontal row-wrap is killed by the constant column mask.
        s = dh * W + dw
        v = vp[:, pad + s:pad + s + HW]
        if dw == -1:
            v = v * cm_neg
        elif dw == 1:
            v = v * cm_pos
        return v

    # ---- ConvTranspose2d(k=2, s=2): one fused tap matmul + scatter matmuls --
    x1f = x1_ref[0]                                               # (Cin, H1*W1)
    taps = jnp.dot(wt_ref[...], x1f, preferred_element_type=f32)  # (4*Cup, H1*W1)
    up = None
    for k in range(4):
        t = jnp.dot(taps[k * Cup:(k + 1) * Cup, :], scat_ref[k],
                    preferred_element_type=f32)                   # (Cup, HW)
        up = t if up is None else up + t
    up = up + bt_ref[...]                                         # (Cup, HW)

    x2f = x2_ref[0]                                               # (Cskip, HW)

    offsets = [(kh - 1, kw - 1) for kh in range(3) for kw in range(3)]

    # ---- conv1 (3x3, pad=1) + ReLU: 9 shifted-view matmuls, no concat -------
    x2p = zero_extend(x2f)
    upp = zero_extend(up)
    acc = None
    for k, (dh, dw) in enumerate(offsets):
        t = jnp.dot(w1s_ref[k], shifted(x2p, dh, dw), preferred_element_type=f32)
        t = t + jnp.dot(w1u_ref[k], shifted(upp, dh, dw), preferred_element_type=f32)
        acc = t if acc is None else acc + t
    y1 = jnp.maximum(acc + b1_ref[...], 0.0)                      # (Cout1, HW)

    # ---- conv2 (3x3, pad=1) + ReLU ------------------------------------------
    y1p = zero_extend(y1)
    acc = None
    for k, (dh, dw) in enumerate(offsets):
        t = jnp.dot(w2_ref[k], shifted(y1p, dh, dw), preferred_element_type=f32)
        acc = t if acc is None else acc + t
    y2 = jnp.maximum(acc + b2_ref[...], 0.0)                      # (Cout, HW)

    o_ref[0] = y2.astype(o_ref.dtype)


def up_forward(x1, x2, params):
    """Up.forward(x1, x2) with NCHW inputs/outputs (PyTorch layout)."""
    wt, bt, w1, b1, w2, b2 = params
    B, Cin, H1, W1 = x1.shape
    _, Cskip, H, W = x2.shape
    assert H == 2 * H1 and W == 2 * W1
    Cup = wt.shape[1]
    Cmid = Cskip + Cup
    Cout1, Cout = w1.shape[0], w2.shape[0]
    assert w1.shape[1] == Cmid
    HW = H * W

    # NCHW -> (B, C, H*W): free reshapes, channel-major stays lane-dense.
    x1f = x1.reshape(B, Cin, H1 * W1)
    x2f = x2.reshape(B, Cskip, HW)

    # Weight repacking (tiny, done once under jit).
    wt_all = jnp.transpose(wt, (2, 3, 1, 0)).reshape(4 * Cup, Cin)   # [(kh*2+kw)*Cup+co, ci]
    bt_r = bt.reshape(Cup, 1)
    w1s = jnp.transpose(w1[:, :Cskip], (2, 3, 0, 1)).reshape(9, Cout1, Cskip)
    w1u = jnp.transpose(w1[:, Cskip:], (2, 3, 0, 1)).reshape(9, Cout1, Cup)
    b1_r = b1.reshape(Cout1, 1)
    w2_r = jnp.transpose(w2, (2, 3, 0, 1)).reshape(9, Cout, Cout1)
    b2_r = b2.reshape(Cout, 1)

    scat = _upsample_scatter(H1, W1)          # (4, H1*W1, HW) constant
    colmask = _col_masks(H, W)                # (2, HW) constant

    kernel = functools.partial(up_kernel, H1=H1, W1=W1)

    block_shapes = [
        (1, Cin, H1 * W1), (1, Cskip, HW), (4 * Cup, Cin), (4, H1 * W1, HW),
        (Cup, 1), (9, Cout1, Cskip), (9, Cout1, Cup), (Cout1, 1),
        (9, Cout, Cout1), (Cout, 1), (2, HW), (1, Cout, HW),
    ]
    per_step_bytes = sum(int(np.prod(s)) for s in block_shapes) * 4
    # Explicit scoped-VMEM limit sized from the per-step buffers (v5e default
    # is only 16 MiB); clamp to a value that is safe on every chip.
    vmem_limit = int(min(64 * 1024 * 1024,
                         max(32 * 1024 * 1024, 2 * per_step_bytes + (4 << 20))))

    out = pl.pallas_call(
        kernel,
        out_shape=jax.ShapeDtypeStruct((B, Cout, HW), x1.dtype),
        grid_spec=pltpu.PrefetchScalarGridSpec(
            num_scalar_prefetch=0,
            grid=(B,),
            in_specs=[
                pl.BlockSpec((1, Cin, H1 * W1), lambda b: (b, 0, 0)),
                pl.BlockSpec((1, Cskip, HW), lambda b: (b, 0, 0)),
                pl.BlockSpec((4 * Cup, Cin), lambda b: (0, 0)),
                pl.BlockSpec((4, H1 * W1, HW), lambda b: (0, 0, 0)),
                pl.BlockSpec((Cup, 1), lambda b: (0, 0)),
                pl.BlockSpec((9, Cout1, Cskip), lambda b: (0, 0, 0)),
                pl.BlockSpec((9, Cout1, Cup), lambda b: (0, 0, 0)),
                pl.BlockSpec((Cout1, 1), lambda b: (0, 0)),
                pl.BlockSpec((9, Cout, Cout1), lambda b: (0, 0, 0)),
                pl.BlockSpec((Cout, 1), lambda b: (0, 0)),
                pl.BlockSpec((2, HW), lambda b: (0, 0)),
            ],
            out_specs=pl.BlockSpec((1, Cout, HW), lambda b: (b, 0, 0)),
        ),
        compiler_params=pltpu.CompilerParams(
            dimension_semantics=("parallel",),
            vmem_limit_bytes=vmem_limit),
    )(x1f, x2f, wt_all, scat, bt_r, w1s, w1u, b1_r, w2_r, b2_r, colmask)

    # (B, Cout, H*W) is already NCHW memory order -> free reshape.
    return out.reshape(B, Cout, H, W)


def init_params(key, in_channels, out_channels):
    """Synthetic Up(in_channels, out_channels, bilinear=False) parameters."""
    k = jax.random.split(key, 6)
    wt = jax.random.normal(k[0], (in_channels, out_channels, 2, 2), jnp.float32) * 0.1
    bt = jax.random.normal(k[1], (out_channels,), jnp.float32) * 0.1
    w1 = jax.random.normal(k[2], (out_channels, in_channels, 3, 3), jnp.float32) * 0.1
    b1 = jax.random.normal(k[3], (out_channels,), jnp.float32) * 0.1
    w2 = jax.random.normal(k[4], (out_channels, out_channels, 3, 3), jnp.float32) * 0.1
    b2 = jax.random.normal(k[5], (out_channels,), jnp.float32) * 0.1
    return (wt, bt, w1, b1, w2, b2)


def up_reference(x1, x2, params):
    """Pure-JAX reference (einsum deconv + lax.conv) for correctness check."""
    wt, bt, w1, b1, w2, b2 = params
    B, Cin, H1, W1 = x1.shape
    Cup = wt.shape[1]
    hp = lax.Precision.HIGHEST
    up = jnp.einsum('bcij,cokl->boikjl', x1, wt, precision=hp)
    up = up.reshape(B, Cup, 2 * H1, 2 * W1) + bt[None, :, None, None]
    x = jnp.concatenate([x2, up], axis=1)
    dn = ('NCHW', 'OIHW', 'NCHW')
    y = lax.conv_general_dilated(x, w1, (1, 1), ((1, 1), (1, 1)),
                                 dimension_numbers=dn, precision=hp)
    y = jnp.maximum(y + b1[None, :, None, None], 0.0)
    y = lax.conv_general_dilated(y, w2, (1, 1), ((1, 1), (1, 1)),
                                 dimension_numbers=dn, precision=hp)
    y = jnp.maximum(y + b2[None, :, None, None], 0.0)
    return y


if __name__ == "__main__":
    key = jax.random.PRNGKey(0)
    kx1, kx2, kp = jax.random.split(key, 3)

    B, in_channels, out_channels = 2, 8, 4
    H1 = W1 = 8
    H, W = 2 * H1, 2 * W1
    Cskip = in_channels - out_channels  # skip-connection channels

    x1 = jax.random.normal(kx1, (B, in_channels, H1, W1), jnp.float32)  # NCHW
    x2 = jax.random.normal(kx2, (B, Cskip, H, W), jnp.float32)          # NCHW
    params = init_params(kp, in_channels, out_channels)

    out = jax.block_until_ready(jax.jit(up_forward)(x1, x2, params))
    ref = jax.block_until_ready(up_reference(x1, x2, params))

    assert out.shape == (B, out_channels, H, W), out.shape
    np.testing.assert_allclose(np.asarray(out), np.asarray(ref),
                               rtol=1e-4, atol=1e-4)

    print("KERNEL_OK")
</pallas_src>

<mosaic_0001>
module attributes {stable_mosaic.version = 11 : i64} {
  func.func @up_kernel(%arg0: i32, %arg1: memref<1x8x64xf32, #tpu.memory_space<vmem>>, %arg2: memref<1x4x256xf32, #tpu.memory_space<vmem>>, %arg3: memref<16x8xf32, #tpu.memory_space<vmem>>, %arg4: memref<4x64x256xf32, #tpu.memory_space<vmem>>, %arg5: memref<4x1xf32, #tpu.memory_space<vmem>>, %arg6: memref<9x4x4xf32, #tpu.memory_space<vmem>>, %arg7: memref<9x4x4xf32, #tpu.memory_space<vmem>>, %arg8: memref<4x1xf32, #tpu.memory_space<vmem>>, %arg9: memref<9x4x4xf32, #tpu.memory_space<vmem>>, %arg10: memref<4x1xf32, #tpu.memory_space<vmem>>, %arg11: memref<2x256xf32, #tpu.memory_space<vmem>>, %arg12: memref<1x4x256xf32, #tpu.memory_space<vmem>>) attributes {dimension_semantics = [#tpu.dimension_semantics<parallel>], iteration_bounds = array<i64: 2>, scalar_prefetch = 0 : i64, scratch_operands = 0 : i64, tpu.core_type = #tpu.core_type<tc>, window_params = [{transform_indices = @transform_0, window_bounds = array<i64: 1, 8, 64>}, {transform_indices = @transform_1, window_bounds = array<i64: 1, 4, 256>}, {pipeline_mode = #tpu.pipeline_mode<synchronous>, transform_indices = @transform_2, window_bounds = array<i64: 16, 8>}, {pipeline_mode = #tpu.pipeline_mode<synchronous>, transform_indices = @transform_3, window_bounds = array<i64: 4, 64, 256>}, {pipeline_mode = #tpu.pipeline_mode<synchronous>, transform_indices = @transform_4, window_bounds = array<i64: 4, 1>}, {pipeline_mode = #tpu.pipeline_mode<synchronous>, transform_indices = @transform_5, window_bounds = array<i64: 9, 4, 4>}, {pipeline_mode = #tpu.pipeline_mode<synchronous>, transform_indices = @transform_6, window_bounds = array<i64: 9, 4, 4>}, {pipeline_mode = #tpu.pipeline_mode<synchronous>, transform_indices = @transform_7, window_bounds = array<i64: 4, 1>}, {pipeline_mode = #tpu.pipeline_mode<synchronous>, transform_indices = @transform_8, window_bounds = array<i64: 9, 4, 4>}, {pipeline_mode = #tpu.pipeline_mode<synchronous>, transform_indices = @transform_9, window_bounds = array<i64: 4, 1>}, {pipeline_mode = #tpu.pipeline_mode<synchronous>, transform_indices = @transform_10, window_bounds = array<i64: 2, 256>}, {transform_indices = @transform_11, window_bounds = array<i64: 1, 4, 256>}]} {
    %c0 = arith.constant 0 : index
    %c0_0 = arith.constant 0 : index
    %0 = vector.load %arg11[%c0, %c0_0] : memref<2x256xf32, #tpu.memory_space<vmem>>, vector<2x256xf32>
    %1 = vector.extract_strided_slice %0 {offsets = [0, 0], sizes = [1, 256], strides = [1, 1]} : vector<2x256xf32> to vector<1x256xf32>
    %2 = vector.extract_strided_slice %0 {offsets = [1, 0], sizes = [1, 256], strides = [1, 1]} : vector<2x256xf32> to vector<1x256xf32>
    %c0_1 = arith.constant 0 : index
    %c0_2 = arith.constant 0 : index
    %c0_3 = arith.constant 0 : index
    %3 = vector.load %arg1[%c0_1, %c0_2, %c0_3] : memref<1x8x64xf32, #tpu.memory_space<vmem>>, vector<1x8x64xf32>
    %4 = vector.shape_cast %3 : vector<1x8x64xf32> to vector<8x64xf32>
    %c0_4 = arith.constant 0 : index
    %c0_5 = arith.constant 0 : index
    %5 = vector.load %arg3[%c0_4, %c0_5] : memref<16x8xf32, #tpu.memory_space<vmem>>, vector<16x8xf32>
    %cst = arith.constant dense<0.000000e+00> : vector<16x64xf32>
    %6 = tpu.matmul %5, %4, %cst {dimension_numbers = #tpu.dot_dimension_numbers<[1], [0], [0], [1], [0, 0, 1, 1], [], []>} : vector<16x8xf32>, vector<8x64xf32>, vector<16x64xf32> -> vector<16x64xf32>
    %7 = vector.extract_strided_slice %6 {offsets = [0, 0], sizes = [4, 64], strides = [1, 1]} : vector<16x64xf32> to vector<4x64xf32>
    %c0_6 = arith.constant 0 : index
    %c0_7 = arith.constant 0 : index
    %c0_8 = arith.constant 0 : index
    %8 = vector.load %arg4[%c0_6, %c0_7, %c0_8] : memref<4x64x256xf32, #tpu.memory_space<vmem>>, vector<1x64x256xf32>
    %9 = vector.shape_cast %8 : vector<1x64x256xf32> to vector<64x256xf32>
    %cst_9 = arith.constant dense<0.000000e+00> : vector<4x256xf32>
    %10 = tpu.matmul %7, %9, %cst_9 {dimension_numbers = #tpu.dot_dimension_numbers<[1], [0], [0], [1], [0, 0, 1, 1], [], []>} : vector<4x64xf32>, vector<64x256xf32>, vector<4x256xf32> -> vector<4x256xf32>
    %11 = vector.extract_strided_slice %6 {offsets = [4, 0], sizes = [4, 64], strides = [1, 1]} : vector<16x64xf32> to vector<4x64xf32>
    %c1 = arith.constant 1 : index
    %c0_10 = arith.constant 0 : index
    %c0_11 = arith.constant 0 : index
    %12 = vector.load %arg4[%c1, %c0_10, %c0_11] : memref<4x64x256xf32, #tpu.memory_space<vmem>>, vector<1x64x256xf32>
    %13 = vector.shape_cast %12 : vector<1x64x256xf32> to vector<64x256xf32>
    %cst_12 = arith.constant dense<0.000000e+00> : vector<4x256xf32>
    %14 = tpu.matmul %11, %13, %cst_12 {dimension_numbers = #tpu.dot_dimension_numbers<[1], [0], [0], [1], [0, 0, 1, 1], [], []>} : vector<4x64xf32>, vector<64x256xf32>, vector<4x256xf32> -> vector<4x256xf32>
    %15 = arith.addf %10, %14 : vector<4x256xf32>
    %16 = vector.extract_strided_slice %6 {offsets = [8, 0], sizes = [4, 64], strides = [1, 1]} : vector<16x64xf32> to vector<4x64xf32>
    %c2 = arith.constant 2 : index
    %c0_13 = arith.constant 0 : index
    %c0_14 = arith.constant 0 : index
    %17 = vector.load %arg4[%c2, %c0_13, %c0_14] : memref<4x64x256xf32, #tpu.memory_space<vmem>>, vector<1x64x256xf32>
    %18 = vector.shape_cast %17 : vector<1x64x256xf32> to vector<64x256xf32>
    %cst_15 = arith.constant dense<0.000000e+00> : vector<4x256xf32>
    %19 = tpu.matmul %16, %18, %cst_15 {dimension_numbers = #tpu.dot_dimension_numbers<[1], [0], [0], [1], [0, 0, 1, 1], [], []>} : vector<4x64xf32>, vector<64x256xf32>, vector<4x256xf32> -> vector<4x256xf32>
    %20 = arith.addf %15, %19 : vector<4x256xf32>
    %21 = vector.extract_strided_slice %6 {offsets = [12, 0], sizes = [4, 64], strides = [1, 1]} : vector<16x64xf32> to vector<4x64xf32>
    %c3 = arith.constant 3 : index
    %c0_16 = arith.constant 0 : index
    %c0_17 = arith.constant 0 : index
    %22 = vector.load %arg4[%c3, %c0_16, %c0_17] : memref<4x64x256xf32, #tpu.memory_space<vmem>>, vector<1x64x256xf32>
    %23 = vector.shape_cast %22 : vector<1x64x256xf32> to vector<64x256xf32>
    %cst_18 = arith.constant dense<0.000000e+00> : vector<4x256xf32>
    %24 = tpu.matmul %21, %23, %cst_18 {dimension_numbers = #tpu.dot_dimension_numbers<[1], [0], [0], [1], [0, 0, 1, 1], [], []>} : vector<4x64xf32>, vector<64x256xf32>, vector<4x256xf32> -> vector<4x256xf32>
    %25 = arith.addf %20, %24 : vector<4x256xf32>
    %c0_19 = arith.constant 0 : index
    %c0_20 = arith.constant 0 : index
    %26 = vector.load %arg5[%c0_19, %c0_20] : memref<4x1xf32, #tpu.memory_space<vmem>>, vector<4x1xf32>
    %27 = vector.broadcast %26 : vector<4x1xf32> to vector<4x256xf32>
    %28 = arith.addf %25, %27 : vector<4x256xf32>
    %c0_21 = arith.constant 0 : index
    %c0_22 = arith.constant 0 : index
    %c0_23 = arith.constant 0 : index
    %29 = vector.load %arg2[%c0_21, %c0_22, %c0_23] : memref<1x4x256xf32, #tpu.memory_space<vmem>>, vector<1x4x256xf32>
    %30 = vector.shape_cast %29 : vector<1x4x256xf32> to vector<4x256xf32>
    %cst_24 = arith.constant 0.000000e+00 : f32
    %31 = vector.broadcast %cst_24 : f32 to vector<4x17xf32>
    %32 = tpu.concatenate %31, %30, %31 in 1 : vector<4x17xf32>, vector<4x256xf32>, vector<4x17xf32> -> vector<4x290xf32>
    %cst_25 = arith.constant 0.000000e+00 : f32
    %33 = vector.broadcast %cst_25 : f32 to vector<4x17xf32>
    %34 = tpu.concatenate %33, %28, %33 in 1 : vector<4x17xf32>, vector<4x256xf32>, vector<4x17xf32> -> vector<4x290xf32>
    %c0_26 = arith.constant 0 : index
    %c0_27 = arith.constant 0 : index
    %c0_28 = arith.constant 0 : index
    %35 = vector.load %arg6[%c0_26, %c0_27, %c0_28] : memref<9x4x4xf32, #tpu.memory_space<vmem>>, vector<1x4x4xf32>
    %36 = vector.shape_cast %35 : vector<1x4x4xf32> to vector<4x4xf32>
    %37 = vector.extract_strided_slice %32 {offsets = [0, 0], sizes = [4, 256], strides = [1, 1]} : vector<4x290xf32> to vector<4x256xf32>
    %38 = vector.broadcast %1 : vector<1x256xf32> to vector<4x256xf32>
    %39 = arith.mulf %37, %38 : vector<4x256xf32>
    %cst_29 = arith.constant dense<0.000000e+00> : vector<4x256xf32>
    %40 = tpu.matmul %36, %39, %cst_29 {dimension_numbers = #tpu.dot_dimension_numbers<[1], [0], [0], [1], [0, 0, 1, 1], [], []>} : vector<4x4xf32>, vector<4x256xf32>, vector<4x256xf32> -> vector<4x256xf32>
    %c0_30 = arith.constant 0 : index
    %c0_31 = arith.constant 0 : index
    %c0_32 = arith.constant 0 : index
    %41 = vector.load %arg7[%c0_30, %c0_31, %c0_32] : memref<9x4x4xf32, #tpu.memory_space<vmem>>, vector<1x4x4xf32>
    %42 = vector.shape_cast %41 : vector<1x4x4xf32> to vector<4x4xf32>
    %43 = vector.extract_strided_slice %34 {offsets = [0, 0], sizes = [4, 256], strides = [1, 1]} : vector<4x290xf32> to vector<4x256xf32>
    %44 = vector.broadcast %1 : vector<1x256xf32> to vector<4x256xf32>
    %45 = arith.mulf %43, %44 : vector<4x256xf32>
    %cst_33 = arith.constant dense<0.000000e+00> : vector<4x256xf32>
    %46 = tpu.matmul %42, %45, %cst_33 {dimension_numbers = #tpu.dot_dimension_numbers<[1], [0], [0], [1], [0, 0, 1, 1], [], []>} : vector<4x4xf32>, vector<4x256xf32>, vector<4x256xf32> -> vector<4x256xf32>
    %47 = arith.addf %40, %46 : vector<4x256xf32>
    %c1_34 = arith.constant 1 : index
    %c0_35 = arith.constant 0 : index
    %c0_36 = arith.constant 0 : index
    %48 = vector.load %arg6[%c1_34, %c0_35, %c0_36] : memref<9x4x4xf32, #tpu.memory_space<vmem>>, vector<1x4x4xf32>
    %49 = vector.shape_cast %48 : vector<1x4x4xf32> to vector<4x4xf32>
    %50 = vector.extract_strided_slice %32 {offsets = [0, 1], sizes = [4, 256], strides = [1, 1]} : vector<4x290xf32> to vector<4x256xf32>
    %cst_37 = arith.constant dense<0.000000e+00> : vector<4x256xf32>
    %51 = tpu.matmul %49, %50, %cst_37 {dimension_numbers = #tpu.dot_dimension_numbers<[1], [0], [0], [1], [0, 0, 1, 1], [], []>} : vector<4x4xf32>, vector<4x256xf32>, vector<4x256xf32> -> vector<4x256xf32>
    %c1_38 = arith.constant 1 : index
    %c0_39 = arith.constant 0 : index
    %c0_40 = arith.constant 0 : index
    %52 = vector.load %arg7[%c1_38, %c0_39, %c0_40] : memref<9x4x4xf32, #tpu.memory_space<vmem>>, vector<1x4x4xf32>
    %53 = vector.shape_cast %52 : vector<1x4x4xf32> to vector<4x4xf32>
    %54 = vector.extract_strided_slice %34 {offsets = [0, 1], sizes = [4, 256], strides = [1, 1]} : vector<4x290xf32> to vector<4x256xf32>
    %cst_41 = arith.constant dense<0.000000e+00> : vector<4x256xf32>
    %55 = tpu.matmul %53, %54, %cst_41 {dimension_numbers = #tpu.dot_dimension_numbers<[1], [0], [0], [1], [0, 0, 1, 1], [], []>} : vector<4x4xf32>, vector<4x256xf32>, vector<4x256xf32> -> vector<4x256xf32>
    %56 = arith.addf %51, %55 : vector<4x256xf32>
    %57 = arith.addf %47, %56 : vector<4x256xf32>
    %c2_42 = arith.constant 2 : index
    %c0_43 = arith.constant 0 : index
    %c0_44 = arith.constant 0 : index
    %58 = vector.load %arg6[%c2_42, %c0_43, %c0_44] : memref<9x4x4xf32, #tpu.memory_space<vmem>>, vector<1x4x4xf32>
    %59 = vector.shape_cast %58 : vector<1x4x4xf32> to vector<4x4xf32>
    %60 = vector.extract_strided_slice %32 {offsets = [0, 2], sizes = [4, 256], strides = [1, 1]} : vector<4x290xf32> to vector<4x256xf32>
    %61 = vector.broadcast %2 : vector<1x256xf32> to vector<4x256xf32>
    %62 = arith.mulf %60, %61 : vector<4x256xf32>
    %cst_45 = arith.constant dense<0.000000e+00> : vector<4x256xf32>
    %63 = tpu.matmul %59, %62, %cst_45 {dimension_numbers = #tpu.dot_dimension_numbers<[1], [0], [0], [1], [0, 0, 1, 1], [], []>} : vector<4x4xf32>, vector<4x256xf32>, vector<4x256xf32> -> vector<4x256xf32>
    %c2_46 = arith.constant 2 : index
    %c0_47 = arith.constant 0 : index
    %c0_48 = arith.constant 0 : index
    %64 = vector.load %arg7[%c2_46, %c0_47, %c0_48] : memref<9x4x4xf32, #tpu.memory_space<vmem>>, vector<1x4x4xf32>
    %65 = vector.shape_cast %64 : vector<1x4x4xf32> to vector<4x4xf32>
    %66 = vector.extract_strided_slice %34 {offsets = [0, 2], sizes = [4, 256], strides = [1, 1]} : vector<4x290xf32> to vector<4x256xf32>
    %67 = vector.broadcast %2 : vector<1x256xf32> to vector<4x256xf32>
    %68 = arith.mulf %66, %67 : vector<4x256xf32>
    %cst_49 = arith.constant dense<0.000000e+00> : vector<4x256xf32>
    %69 = tpu.matmul %65, %68, %cst_49 {dimension_numbers = #tpu.dot_dimension_numbers<[1], [0], [0], [1], [0, 0, 1, 1], [], []>} : vector<4x4xf32>, vector<4x256xf32>, vector<4x256xf32> -> vector<4x256xf32>
    %70 = arith.addf %63, %69 : vector<4x256xf32>
    %71 = arith.addf %57, %70 : vector<4x256xf32>
    %c3_50 = arith.constant 3 : index
    %c0_51 = arith.constant 0 : index
    %c0_52 = arith.constant 0 : index
    %72 = vector.load %arg6[%c3_50, %c0_51, %c0_52] : memref<9x4x4xf32, #tpu.memory_space<vmem>>, vector<1x4x4xf32>
    %73 = vector.shape_cast %72 : vector<1x4x4xf32> to vector<4x4xf32>
    %74 = vector.extract_strided_slice %32 {offsets = [0, 16], sizes = [4, 256], strides = [1, 1]} : vector<4x290xf32> to vector<4x256xf32>
    %75 = vector.broadcast %1 : vector<1x256xf32> to vector<4x256xf32>
    %76 = arith.mulf %74, %75 : vector<4x256xf32>
    %cst_53 = arith.constant dense<0.000000e+00> : vector<4x256xf32>
    %77 = tpu.matmul %73, %76, %cst_53 {dimension_numbers = #tpu.dot_dimension_numbers<[1], [0], [0], [1], [0, 0, 1, 1], [], []>} : vector<4x4xf32>, vector<4x256xf32>, vector<4x256xf32> -> vector<4x256xf32>
    %c3_54 = arith.constant 3 : index
    %c0_55 = arith.constant 0 : index
    %c0_56 = arith.constant 0 : index
    %78 = vector.load %arg7[%c3_54, %c0_55, %c0_56] : memref<9x4x4xf32, #tpu.memory_space<vmem>>, vector<1x4x4xf32>
    %79 = vector.shape_cast %78 : vector<1x4x4xf32> to vector<4x4xf32>
    %80 = vector.extract_strided_slice %34 {offsets = [0, 16], sizes = [4, 256], strides = [1, 1]} : vector<4x290xf32> to vector<4x256xf32>
    %81 = vector.broadcast %1 : vector<1x256xf32> to vector<4x256xf32>
    %82 = arith.mulf %80, %81 : vector<4x256xf32>
    %cst_57 = arith.constant dense<0.000000e+00> : vector<4x256xf32>
    %83 = tpu.matmul %79, %82, %cst_57 {dimension_numbers = #tpu.dot_dimension_numbers<[1], [0], [0], [1], [0, 0, 1, 1], [], []>} : vector<4x4xf32>, vector<4x256xf32>, vector<4x256xf32> -> vector<4x256xf32>
    %84 = arith.addf %77, %83 : vector<4x256xf32>
    %85 = arith.addf %71, %84 : vector<4x256xf32>
    %c4 = arith.constant 4 : index
    %c0_58 = arith.constant 0 : index
    %c0_59 = arith.constant 0 : index
    %86 = vector.load %arg6[%c4, %c0_58, %c0_59] : memref<9x4x4xf32, #tpu.memory_space<vmem>>, vector<1x4x4xf32>
    %87 = vector.shape_cast %86 : vector<1x4x4xf32> to vector<4x4xf32>
    %88 = vector.extract_strided_slice %32 {offsets = [0, 17], sizes = [4, 256], strides = [1, 1]} : vector<4x290xf32> to vector<4x256xf32>
    %cst_60 = arith.constant dense<0.000000e+00> : vector<4x256xf32>
    %89 = tpu.matmul %87, %88, %cst_60 {dimension_numbers = #tpu.dot_dimension_numbers<[1], [0], [0], [1], [0, 0, 1, 1], [], []>} : vector<4x4xf32>, vector<4x256xf32>, vector<4x256xf32> -> vector<4x256xf32>
    %c4_61 = arith.constant 4 : index
    %c0_62 = arith.constant 0 : index
    %c0_63 = arith.constant 0 : index
    %90 = vector.load %arg7[%c4_61, %c0_62, %c0_63] : memref<9x4x4xf32, #tpu.memory_space<vmem>>, vector<1x4x4xf32>
    %91 = vector.shape_cast %90 : vector<1x4x4xf32> to vector<4x4xf32>
    %92 = vector.extract_strided_slice %34 {offsets = [0, 17], sizes = [4, 256], strides = [1, 1]} : vector<4x290xf32> to vector<4x256xf32>
    %cst_64 = arith.constant dense<0.000000e+00> : vector<4x256xf32>
    %93 = tpu.matmul %91, %92, %cst_64 {dimension_numbers = #tpu.dot_dimension_numbers<[1], [0], [0], [1], [0, 0, 1, 1], [], []>} : vector<4x4xf32>, vector<4x256xf32>, vector<4x256xf32> -> vector<4x256xf32>
    %94 = arith.addf %89, %93 : vector<4x256xf32>
    %95 = arith.addf %85, %94 : vector<4x256xf32>
    %c5 = arith.constant 5 : index
    %c0_65 = arith.constant 0 : index
    %c0_66 = arith.constant 0 : index
    %96 = vector.load %arg6[%c5, %c0_65, %c0_66] : memref<9x4x4xf32, #tpu.memory_space<vmem>>, vector<1x4x4xf32>
    %97 = vector.shape_cast %96 : vector<1x4x4xf32> to vector<4x4xf32>
    %98 = vector.extract_strided_slice %32 {offsets = [0, 18], sizes = [4, 256], strides = [1, 1]} : vector<4x290xf32> to vector<4x256xf32>
    %99 = vector.broadcast %2 : vector<1x256xf32> to vector<4x256xf32>
    %100 = arith.mulf %98, %99 : vector<4x256xf32>
    %cst_67 = arith.constant dense<0.000000e+00> : vector<4x256xf32>
    %101 = tpu.matmul %97, %100, %cst_67 {dimension_numbers = #tpu.dot_dimension_numbers<[1], [0], [0], [1], [0, 0, 1, 1], [], []>} : vector<4x4xf32>, vector<4x256xf32>, vector<4x256xf32> -> vector<4x256xf32>
    %c5_68 = arith.constant 5 : index
    %c0_69 = arith.constant 0 : index
    %c0_70 = arith.constant 0 : index
    %102 = vector.load %arg7[%c5_68, %c0_69, %c0_70] : memref<9x4x4xf32, #tpu.memory_space<vmem>>, vector<1x4x4xf32>
    %103 = vector.shape_cast %102 : vector<1x4x4xf32> to vector<4x4xf32>
    %104 = vector.extract_strided_slice %34 {offsets = [0, 18], sizes = [4, 256], strides = [1, 1]} : vector<4x290xf32> to vector<4x256xf32>
    %105 = vector.broadcast %2 : vector<1x256xf32> to vector<4x256xf32>
    %106 = arith.mulf %104, %105 : vector<4x256xf32>
    %cst_71 = arith.constant dense<0.000000e+00> : vector<4x256xf32>
    %107 = tpu.matmul %103, %106, %cst_71 {dimension_numbers = #tpu.dot_dimension_numbers<[1], [0], [0], [1], [0, 0, 1, 1], [], []>} : vector<4x4xf32>, vector<4x256xf32>, vector<4x256xf32> -> vector<4x256xf32>
    %108 = arith.addf %101, %107 : vector<4x256xf32>
    %109 = arith.addf %95, %108 : vector<4x256xf32>
    %c6 = arith.constant 6 : index
    %c0_72 = arith.constant 0 : index
    %c0_73 = arith.constant 0 : index
    %110 = vector.load %arg6[%c6, %c0_72, %c0_73] : memref<9x4x4xf32, #tpu.memory_space<vmem>>, vector<1x4x4xf32>
    %111 = vector.shape_cast %110 : vector<1x4x4xf32> to vector<4x4xf32>
    %112 = vector.extract_strided_slice %32 {offsets = [0, 32], sizes = [4, 256], strides = [1, 1]} : vector<4x290xf32> to vector<4x256xf32>
    %113 = vector.broadcast %1 : vector<1x256xf32> to vector<4x256xf32>
    %114 = arith.mulf %112, %113 : vector<4x256xf32>
    %cst_74 = arith.constant dense<0.000000e+00> : vector<4x256xf32>
    %115 = tpu.matmul %111, %114, %cst_74 {dimension_numbers = #tpu.dot_dimension_numbers<[1], [0], [0], [1], [0, 0, 1, 1], [], []>} : vector<4x4xf32>, vector<4x256xf32>, vector<4x256xf32> -> vector<4x256xf32>
    %c6_75 = arith.constant 6 : index
    %c0_76 = arith.constant 0 : index
    %c0_77 = arith.constant 0 : index
    %116 = vector.load %arg7[%c6_75, %c0_76, %c0_77] : memref<9x4x4xf32, #tpu.memory_space<vmem>>, vector<1x4x4xf32>
    %117 = vector.shape_cast %116 : vector<1x4x4xf32> to vector<4x4xf32>
    %118 = vector.extract_strided_slice %34 {offsets = [0, 32], sizes = [4, 256], strides = [1, 1]} : vector<4x290xf32> to vector<4x256xf32>
    %119 = vector.broadcast %1 : vector<1x256xf32> to vector<4x256xf32>
    %120 = arith.mulf %118, %119 : vector<4x256xf32>
    %cst_78 = arith.constant dense<0.000000e+00> : vector<4x256xf32>
    %121 = tpu.matmul %117, %120, %cst_78 {dimension_numbers = #tpu.dot_dimension_numbers<[1], [0], [0], [1], [0, 0, 1, 1], [], []>} : vector<4x4xf32>, vector<4x256xf32>, vector<4x256xf32> -> vector<4x256xf32>
    %122 = arith.addf %115, %121 : vector<4x256xf32>
    %123 = arith.addf %109, %122 : vector<4x256xf32>
    %c7 = arith.constant 7 : index
    %c0_79 = arith.constant 0 : index
    %c0_80 = arith.constant 0 : index
    %124 = vector.load %arg6[%c7, %c0_79, %c0_80] : memref<9x4x4xf32, #tpu.memory_space<vmem>>, vector<1x4x4xf32>
    %125 = vector.shape_cast %124 : vector<1x4x4xf32> to vector<4x4xf32>
    %126 = vector.extract_strided_slice %32 {offsets = [0, 33], sizes = [4, 256], strides = [1, 1]} : vector<4x290xf32> to vector<4x256xf32>
    %cst_81 = arith.constant dense<0.000000e+00> : vector<4x256xf32>
    %127 = tpu.matmul %125, %126, %cst_81 {dimension_numbers = #tpu.dot_dimension_numbers<[1], [0], [0], [1], [0, 0, 1, 1], [], []>} : vector<4x4xf32>, vector<4x256xf32>, vector<4x256xf32> -> vector<4x256xf32>
    %c7_82 = arith.constant 7 : index
    %c0_83 = arith.constant 0 : index
    %c0_84 = arith.constant 0 : index
    %128 = vector.load %arg7[%c7_82, %c0_83, %c0_84] : memref<9x4x4xf32, #tpu.memory_space<vmem>>, vector<1x4x4xf32>
    %129 = vector.shape_cast %128 : vector<1x4x4xf32> to vector<4x4xf32>
    %130 = vector.extract_strided_slice %34 {offsets = [0, 33], sizes = [4, 256], strides = [1, 1]} : vector<4x290xf32> to vector<4x256xf32>
    %cst_85 = arith.constant dense<0.000000e+00> : vector<4x256xf32>
    %131 = tpu.matmul %129, %130, %cst_85 {dimension_numbers = #tpu.dot_dimension_numbers<[1], [0], [0], [1], [0, 0, 1, 1], [], []>} : vector<4x4xf32>, vector<4x256xf32>, vector<4x256xf32> -> vector<4x256xf32>
    %132 = arith.addf %127, %131 : vector<4x256xf32>
    %133 = arith.addf %123, %132 : vector<4x256xf32>
    %c8 = arith.constant 8 : index
    %c0_86 = arith.constant 0 : index
    %c0_87 = arith.constant 0 : index
    %134 = vector.load %arg6[%c8, %c0_86, %c0_87] : memref<9x4x4xf32, #tpu.memory_space<vmem>>, vector<1x4x4xf32>
    %135 = vector.shape_cast %134 : vector<1x4x4xf32> to vector<4x4xf32>
    %136 = vector.extract_strided_slice %32 {offsets = [0, 34], sizes = [4, 256], strides = [1, 1]} : vector<4x290xf32> to vector<4x256xf32>
    %137 = vector.broadcast %2 : vector<1x256xf32> to vector<4x256xf32>
    %138 = arith.mulf %136, %137 : vector<4x256xf32>
    %cst_88 = arith.constant dense<0.000000e+00> : vector<4x256xf32>
    %139 = tpu.matmul %135, %138, %cst_88 {dimension_numbers = #tpu.dot_dimension_numbers<[1], [0], [0], [1], [0, 0, 1, 1], [], []>} : vector<4x4xf32>, vector<4x256xf32>, vector<4x256xf32> -> vector<4x256xf32>
    %c8_89 = arith.constant 8 : index
    %c0_90 = arith.constant 0 : index
    %c0_91 = arith.constant 0 : index
    %140 = vector.load %arg7[%c8_89, %c0_90, %c0_91] : memref<9x4x4xf32, #tpu.memory_space<vmem>>, vector<1x4x4xf32>
    %141 = vector.shape_cast %140 : vector<1x4x4xf32> to vector<4x4xf32>
    %142 = vector.extract_strided_slice %34 {offsets = [0, 34], sizes = [4, 256], strides = [1, 1]} : vector<4x290xf32> to vector<4x256xf32>
    %143 = vector.broadcast %2 : vector<1x256xf32> to vector<4x256xf32>
    %144 = arith.mulf %142, %143 : vector<4x256xf32>
    %cst_92 = arith.constant dense<0.000000e+00> : vector<4x256xf32>
    %145 = tpu.matmul %141, %144, %cst_92 {dimension_numbers = #tpu.dot_dimension_numbers<[1], [0], [0], [1], [0, 0, 1, 1], [], []>} : vector<4x4xf32>, vector<4x256xf32>, vector<4x256xf32> -> vector<4x256xf32>
    %146 = arith.addf %139, %145 : vector<4x256xf32>
    %147 = arith.addf %133, %146 : vector<4x256xf32>
    %c0_93 = arith.constant 0 : index
    %c0_94 = arith.constant 0 : index
    %148 = vector.load %arg8[%c0_93, %c0_94] : memref<4x1xf32, #tpu.memory_space<vmem>>, vector<4x1xf32>
    %149 = vector.broadcast %148 : vector<4x1xf32> to vector<4x256xf32>
    %150 = arith.addf %147, %149 : vector<4x256xf32>
    %cst_95 = arith.constant 0.000000e+00 : f32
    %151 = vector.broadcast %cst_95 : f32 to vector<4x256xf32>
    %152 = arith.maximumf %150, %151 : vector<4x256xf32>
    %cst_96 = arith.constant 0.000000e+00 : f32
    %153 = vector.broadcast %cst_96 : f32 to vector<4x17xf32>
    %154 = tpu.concatenate %153, %152, %153 in 1 : vector<4x17xf32>, vector<4x256xf32>, vector<4x17xf32> -> vector<4x290xf32>
    %c0_97 = arith.constant 0 : index
    %c0_98 = arith.constant 0 : index
    %c0_99 = arith.constant 0 : index
    %155 = vector.load %arg9[%c0_97, %c0_98, %c0_99] : memref<9x4x4xf32, #tpu.memory_space<vmem>>, vector<1x4x4xf32>
    %156 = vector.shape_cast %155 : vector<1x4x4xf32> to vector<4x4xf32>
    %157 = vector.extract_strided_slice %154 {offsets = [0, 0], sizes = [4, 256], strides = [1, 1]} : vector<4x290xf32> to vector<4x256xf32>
    %158 = vector.broadcast %1 : vector<1x256xf32> to vector<4x256xf32>
    %159 = arith.mulf %157, %158 : vector<4x256xf32>
    %cst_100 = arith.constant dense<0.000000e+00> : vector<4x256xf32>
    %160 = tpu.matmul %156, %159, %cst_100 {dimension_numbers = #tpu.dot_dimension_numbers<[1], [0], [0], [1], [0, 0, 1, 1], [], []>} : vector<4x4xf32>, vector<4x256xf32>, vector<4x256xf32> -> vector<4x256xf32>
    %c1_101 = arith.constant 1 : index
    %c0_102 = arith.constant 0 : index
    %c0_103 = arith.constant 0 : index
    %161 = vector.load %arg9[%c1_101, %c0_102, %c0_103] : memref<9x4x4xf32, #tpu.memory_space<vmem>>, vector<1x4x4xf32>
    %162 = vector.shape_cast %161 : vector<1x4x4xf32> to vector<4x4xf32>
    %163 = vector.extract_strided_slice %154 {offsets = [0, 1], sizes = [4, 256], strides = [1, 1]} : vector<4x290xf32> to vector<4x256xf32>
    %cst_104 = arith.constant dense<0.000000e+00> : vector<4x256xf32>
    %164 = tpu.matmul %162, %163, %cst_104 {dimension_numbers = #tpu.dot_dimension_numbers<[1], [0], [0], [1], [0, 0, 1, 1], [], []>} : vector<4x4xf32>, vector<4x256xf32>, vector<4x256xf32> -> vector<4x256xf32>
    %165 = arith.addf %160, %164 : vector<4x256xf32>
    %c2_105 = arith.constant 2 : index
    %c0_106 = arith.constant 0 : index
    %c0_107 = arith.constant 0 : index
    %166 = vector.load %arg9[%c2_105, %c0_106, %c0_107] : memref<9x4x4xf32, #tpu.memory_space<vmem>>, vector<1x4x4xf32>
    %167 = vector.shape_cast %166 : vector<1x4x4xf32> to vector<4x4xf32>
    %168 = vector.extract_strided_slice %154 {offsets = [0, 2], sizes = [4, 256], strides = [1, 1]} : vector<4x290xf32> to vector<4x256xf32>
    %169 = vector.broadcast %2 : vector<1x256xf32> to vector<4x256xf32>
    %170 = arith.mulf %168, %169 : vector<4x256xf32>
    %cst_108 = arith.constant dense<0.000000e+00> : vector<4x256xf32>
    %171 = tpu.matmul %167, %170, %cst_108 {dimension_numbers = #tpu.dot_dimension_numbers<[1], [0], [0], [1], [0, 0, 1, 1], [], []>} : vector<4x4xf32>, vector<4x256xf32>, vector<4x256xf32> -> vector<4x256xf32>
    %172 = arith.addf %165, %171 : vector<4x256xf32>
    %c3_109 = arith.constant 3 : index
    %c0_110 = arith.constant 0 : index
    %c0_111 = arith.constant 0 : index
    %173 = vector.load %arg9[%c3_109, %c0_110, %c0_111] : memref<9x4x4xf32, #tpu.memory_space<vmem>>, vector<1x4x4xf32>
    %174 = vector.shape_cast %173 : vector<1x4x4xf32> to vector<4x4xf32>
    %175 = vector.extract_strided_slice %154 {offsets = [0, 16], sizes = [4, 256], strides = [1, 1]} : vector<4x290xf32> to vector<4x256xf32>
    %176 = vector.broadcast %1 : vector<1x256xf32> to vector<4x256xf32>
    %177 = arith.mulf %175, %176 : vector<4x256xf32>
    %cst_112 = arith.constant dense<0.000000e+00> : vector<4x256xf32>
    %178 = tpu.matmul %174, %177, %cst_112 {dimension_numbers = #tpu.dot_dimension_numbers<[1], [0], [0], [1], [0, 0, 1, 1], [], []>} : vector<4x4xf32>, vector<4x256xf32>, vector<4x256xf32> -> vector<4x256xf32>
    %179 = arith.addf %172, %178 : vector<4x256xf32>
    %c4_113 = arith.constant 4 : index
    %c0_114 = arith.constant 0 : index
    %c0_115 = arith.constant 0 : index
    %180 = vector.load %arg9[%c4_113, %c0_114, %c0_115] : memref<9x4x4xf32, #tpu.memory_space<vmem>>, vector<1x4x4xf32>
    %181 = vector.shape_cast %180 : vector<1x4x4xf32> to vector<4x4xf32>
    %182 = vector.extract_strided_slice %154 {offsets = [0, 17], sizes = [4, 256], strides = [1, 1]} : vector<4x290xf32> to vector<4x256xf32>
    %cst_116 = arith.constant dense<0.000000e+00> : vector<4x256xf32>
    %183 = tpu.matmul %181, %182, %cst_116 {dimension_numbers = #tpu.dot_dimension_numbers<[1], [0], [0], [1], [0, 0, 1, 1], [], []>} : vector<4x4xf32>, vector<4x256xf32>, vector<4x256xf32> -> vector<4x256xf32>
    %184 = arith.addf %179, %183 : vector<4x256xf32>
    %c5_117 = arith.constant 5 : index
    %c0_118 = arith.constant 0 : index
    %c0_119 = arith.constant 0 : index
    %185 = vector.load %arg9[%c5_117, %c0_118, %c0_119] : memref<9x4x4xf32, #tpu.memory_space<vmem>>, vector<1x4x4xf32>
    %186 = vector.shape_cast %185 : vector<1x4x4xf32> to vector<4x4xf32>
    %187 = vector.extract_strided_slice %154 {offsets = [0, 18], sizes = [4, 256], strides = [1, 1]} : vector<4x290xf32> to vector<4x256xf32>
    %188 = vector.broadcast %2 : vector<1x256xf32> to vector<4x256xf32>
    %189 = arith.mulf %187, %188 : vector<4x256xf32>
    %cst_120 = arith.constant dense<0.000000e+00> : vector<4x256xf32>
    %190 = tpu.matmul %186, %189, %cst_120 {dimension_numbers = #tpu.dot_dimension_numbers<[1], [0], [0], [1], [0, 0, 1, 1], [], []>} : vector<4x4xf32>, vector<4x256xf32>, vector<4x256xf32> -> vector<4x256xf32>
    %191 = arith.addf %184, %190 : vector<4x256xf32>
    %c6_121 = arith.constant 6 : index
    %c0_122 = arith.constant 0 : index
    %c0_123 = arith.constant 0 : index
    %192 = vector.load %arg9[%c6_121, %c0_122, %c0_123] : memref<9x4x4xf32, #tpu.memory_space<vmem>>, vector<1x4x4xf32>
    %193 = vector.shape_cast %192 : vector<1x4x4xf32> to vector<4x4xf32>
    %194 = vector.extract_strided_slice %154 {offsets = [0, 32], sizes = [4, 256], strides = [1, 1]} : vector<4x290xf32> to vector<4x256xf32>
    %195 = vector.broadcast %1 : vector<1x256xf32> to vector<4x256xf32>
    %196 = arith.mulf %194, %195 : vector<4x256xf32>
    %cst_124 = arith.constant dense<0.000000e+00> : vector<4x256xf32>
    %197 = tpu.matmul %193, %196, %cst_124 {dimension_numbers = #tpu.dot_dimension_numbers<[1], [0], [0], [1], [0, 0, 1, 1], [], []>} : vector<4x4xf32>, vector<4x256xf32>, vector<4x256xf32> -> vector<4x256xf32>
    %198 = arith.addf %191, %197 : vector<4x256xf32>
    %c7_125 = arith.constant 7 : index
    %c0_126 = arith.constant 0 : index
    %c0_127 = arith.constant 0 : index
    %199 = vector.load %arg9[%c7_125, %c0_126, %c0_127] : memref<9x4x4xf32, #tpu.memory_space<vmem>>, vector<1x4x4xf32>
    %200 = vector.shape_cast %199 : vector<1x4x4xf32> to vector<4x4xf32>
    %201 = vector.extract_strided_slice %154 {offsets = [0, 33], sizes = [4, 256], strides = [1, 1]} : vector<4x290xf32> to vector<4x256xf32>
    %cst_128 = arith.constant dense<0.000000e+00> : vector<4x256xf32>
    %202 = tpu.matmul %200, %201, %cst_128 {dimension_numbers = #tpu.dot_dimension_numbers<[1], [0], [0], [1], [0, 0, 1, 1], [], []>} : vector<4x4xf32>, vector<4x256xf32>, vector<4x256xf32> -> vector<4x256xf32>
    %203 = arith.addf %198, %202 : vector<4x256xf32>
    %c8_129 = arith.constant 8 : index
    %c0_130 = arith.constant 0 : index
    %c0_131 = arith.constant 0 : index
    %204 = vector.load %arg9[%c8_129, %c0_130, %c0_131] : memref<9x4x4xf32, #tpu.memory_space<vmem>>, vector<1x4x4xf32>
    %205 = vector.shape_cast %204 : vector<1x4x4xf32> to vector<4x4xf32>
    %206 = vector.extract_strided_slice %154 {offsets = [0, 34], sizes = [4, 256], strides = [1, 1]} : vector<4x290xf32> to vector<4x256xf32>
    %207 = vector.broadcast %2 : vector<1x256xf32> to vector<4x256xf32>
    %208 = arith.mulf %206, %207 : vector<4x256xf32>
    %cst_132 = arith.constant dense<0.000000e+00> : vector<4x256xf32>
    %209 = tpu.matmul %205, %208, %cst_132 {dimension_numbers = #tpu.dot_dimension_numbers<[1], [0], [0], [1], [0, 0, 1, 1], [], []>} : vector<4x4xf32>, vector<4x256xf32>, vector<4x256xf32> -> vector<4x256xf32>
    %210 = arith.addf %203, %209 : vector<4x256xf32>
    %c0_133 = arith.constant 0 : index
    %c0_134 = arith.constant 0 : index
    %211 = vector.load %arg10[%c0_133, %c0_134] : memref<4x1xf32, #tpu.memory_space<vmem>>, vector<4x1xf32>
    %212 = vector.broadcast %211 : vector<4x1xf32> to vector<4x256xf32>
    %213 = arith.addf %210, %212 : vector<4x256xf32>
    %cst_135 = arith.constant 0.000000e+00 : f32
    %214 = vector.broadcast %cst_135 : f32 to vector<4x256xf32>
    %215 = arith.maximumf %213, %214 : vector<4x256xf32>
    %c0_136 = arith.constant 0 : index
    %c0_137 = arith.constant 0 : index
    %c0_138 = arith.constant 0 : index
    %216 = vector.load %arg12[%c0_136, %c0_137, %c0_138] : memref<1x4x256xf32, #tpu.memory_space<vmem>>, vector<1x4x256xf32>
    %217 = vector.shape_cast %216 : vector<1x4x256xf32> to vector<4x256xf32>
    %218 = vector.shape_cast %215 : vector<4x256xf32> to vector<1x4x256xf32>
    tpu.vector_store %arg12[%c0_136, %c0_137, %c0_138], %218 {strides = array<i32>} : memref<1x4x256xf32, #tpu.memory_space<vmem>>, vector<1x4x256xf32>,
    return
  }
  func.func @transform_0(%arg0: i32) -> (i32, i32, i32) {
    %c0_i32 = arith.constant 0 : i32
    %c0_i32_0 = arith.constant 0 : i32
    %c0_i32_1 = arith.constant 0 : i32
    return %arg0, %c0_i32, %c0_i32_0 : i32, i32, i32
  }
  func.func @transform_1(%arg0: i32) -> (i32, i32, i32) {
    %c0_i32 = arith.constant 0 : i32
    %c0_i32_0 = arith.constant 0 : i32
    %c0_i32_1 = arith.constant 0 : i32
    return %arg0, %c0_i32, %c0_i32_0 : i32, i32, i32
  }
  func.func @transform_2(%arg0: i32) -> (i32, i32) {
    %c0_i32 = arith.constant 0 : i32
    %c0_i32_0 = arith.constant 0 : i32
    %c0_i32_1 = arith.constant 0 : i32
    return %c0_i32, %c0_i32_0 : i32, i32
  }
  func.func @transform_3(%arg0: i32) -> (i32, i32, i32) {
    %c0_i32 = arith.constant 0 : i32
    %c0_i32_0 = arith.constant 0 : i32
    %c0_i32_1 = arith.constant 0 : i32
    %c0_i32_2 = arith.constant 0 : i32
    return %c0_i32, %c0_i32_0, %c0_i32_1 : i32, i32, i32
  }
  func.func @transform_4(%arg0: i32) -> (i32, i32) {
    %c0_i32 = arith.constant 0 : i32
    %c0_i32_0 = arith.constant 0 : i32
    %c0_i32_1 = arith.constant 0 : i32
    return %c0_i32, %c0_i32_0 : i32, i32
  }
  func.func @transform_5(%arg0: i32) -> (i32, i32, i32) {
    %c0_i32 = arith.constant 0 : i32
    %c0_i32_0 = arith.constant 0 : i32
    %c0_i32_1 = arith.constant 0 : i32
    %c0_i32_2 = arith.constant 0 : i32
    return %c0_i32, %c0_i32_0, %c0_i32_1 : i32, i32, i32
  }
  func.func @transform_6(%arg0: i32) -> (i32, i32, i32) {
    %c0_i32 = arith.constant 0 : i32
    %c0_i32_0 = arith.constant 0 : i32
    %c0_i32_1 = arith.constant 0 : i32
    %c0_i32_2 = arith.constant 0 : i32
    return %c0_i32, %c0_i32_0, %c0_i32_1 : i32, i32, i32
  }
  func.func @transform_7(%arg0: i32) -> (i32, i32) {
    %c0_i32 = arith.constant 0 : i32
    %c0_i32_0 = arith.constant 0 : i32
    %c0_i32_1 = arith.constant 0 : i32
    return %c0_i32, %c0_i32_0 : i32, i32
  }
  func.func @transform_8(%arg0: i32) -> (i32, i32, i32) {
    %c0_i32 = arith.constant 0 : i32
    %c0_i32_0 = arith.constant 0 : i32
    %c0_i32_1 = arith.constant 0 : i32
    %c0_i32_2 = arith.constant 0 : i32
    return %c0_i32, %c0_i32_0, %c0_i32_1 : i32, i32, i32
  }
  func.func @transform_9(%arg0: i32) -> (i32, i32) {
    %c0_i32 = arith.constant 0 : i32
    %c0_i32_0 = arith.constant 0 : i32
    %c0_i32_1 = arith.constant 0 : i32
    return %c0_i32, %c0_i32_0 : i32, i32
  }
  func.func @transform_10(%arg0: i32) -> (i32, i32) {
    %c0_i32 = arith.constant 0 : i32
    %c0_i32_0 = arith.constant 0 : i32
    %c0_i32_1 = arith.constant 0 : i32
    return %c0_i32, %c0_i32_0 : i32, i32
  }
  func.func @transform_11(%arg0: i32) -> (i32, i32, i32) {
    %c0_i32 = arith.constant 0 : i32
    %c0_i32_0 = arith.constant 0 : i32
    %c0_i32_1 = arith.constant 0 : i32
    return %arg0, %c0_i32, %c0_i32_0 : i32, i32, i32
  }
}

</mosaic_0001>

<bundles_post_ra>
// kernel: up_forward.1
= control target key start
LH: loop header
LB: loop body
LE: loop exit
PB: predicated region body
PF: predicated region fallthrough
CT: control target
= control target key end

     0   :  { %16 = vsyncpa [#allocation3], 0  ;;  %s2889_s17 = smov 0   ;;  %s3448_s0 = inlined_call_operand.vmem [shape: f32[2,8,64], index: 0, kind: input, shape index: {}]   ;;  %s3449_s1 = inlined_call_operand.vmem [shape: f32[2,4,256], index: 1, kind: input, shape index: {}]   ;;  %s3450_s2 = inlined_call_operand.vmem [shape: f32[16,8], index: 2, kind: input, shape index: {}]   ;;  %s3451_s3 = inlined_call_operand.hbm [shape: f32[4,64,256], index: 3, kind: input, shape index: {}]   ;;  %s3452_s4 = inlined_call_operand.vmem [shape: f32[4,1], index: 4, kind: input, shape index: {}]   ;;  %s3453_s5 = inlined_call_operand.vmem [shape: f32[9,4,4], index: 5, kind: input, shape index: {}]   ;;  %s3454_s6 = inlined_call_operand.vmem [shape: f32[9,4,4], index: 6, kind: input, shape index: {}]   ;;  %s3455_s7 = inlined_call_operand.vmem [shape: f32[4,1], index: 7, kind: input, shape index: {}]   ;;  %s3456_s8 = inlined_call_operand.vmem [shape: f32[9,4,4], index: 8, kind: input, shape index: {}]   ;;  %s3457_s9 = inlined_call_operand.vmem [shape: f32[4,1], index: 9, kind: input, shape index: {}]   ;;  %s3458_s10 = inlined_call_operand.vmem [shape: f32[2,256], index: 10, kind: input, shape index: {}]   ;;  %s3459_s11 = inlined_call_operand.vmem [shape: f32[2,4,256], index: 11, kind: output, shape index: {}]  }
   0x1 LB: > { %s308_s20 = sshll.u32 %s3451_s3, 4  ;;  %s2574_s21 = sadd.s32 4294967295, %s2809_s17   ;;  %s2809_s17 = sphi %s2889_s17, %s22_s17   ;;  %s309_s20 = int_to_ptr.hbm [resolvable:$true] %s308_s20 }
   0x2   : > { %p2576_p0 = scmp.ge.s32.totalorder %s2809_s17, 1  ;;  %p294_p1 = scmp.lt.s32.totalorder %s2809_s17, 3 }
   0x3   : > { %p2740_p2 = scmp.eq.s32.totalorder %s2574_s21, 0  ;;  %s2811_s22 = smov [#allocation2]  }
   0x4   : > { %p295_p3 = pnand %p2576_p0, %p294_p1  ;;  %s310_s23 = sshll.u32 %s2811_s22, 4  ;;  %s311_s23 = int_to_ptr.vmem [resolvable:$true] %s310_s23 }
   0x5   : > { %s2812_s24 = smov 256   ;;  %s2813_s25 = smov 16  }
   0x6   : > { %p2736_p4 = pneg %p295_p3  ;;  %362 = sbr.rel (%p295_p3) target bundleno = 1196 (0x4ac), region = 64 }
   0x8   : > { %p2737_p5 = pnand %p2740_p2, %p2736_p4 }
   0xa   : > { %2739 = dma.hbm_to_vmem [thread:$0]  (!%p2737_p5), %s309_s20, 8192, %s311_s23, [#allocation3], %s2812_s24, %s2812_s24, %s2813_s25  }
   0xb   : > { %2804 = dma.done.wait (%p2740_p2), [#allocation3], 8192  }
   0xc   : > { %2806 = vsyncadd (%p2740_p2), [#allocation3], 4294959104  ;;  %p407_p6 = scmp.lt.s32.totalorder %s2574_s21, 1  ;;  %v2814_v0 = vmov 0   ;;  %vm425_vm0 = vcmask 64512   ;;  %v423_v3 = vld [vmem:[%s3450_s2] sm:$0xff] }
   0xd   : > { %2768 = vset.pattern.permute.xlu0 %v2814_v0  ;;  %v699_v4 = vld [vmem:[%s3452_s4] sm:$0xf]  ;;  %v486_v5 = vld [vmem:[#allocation2 + $0xf0] sm:$0xff]  ;;  %v484_v12 = vld [vmem:[#allocation2 + $0xe0] sm:$0xff]  ;;  %s2815_s23 = smov 16   ;;  %s2816_s24 = smov 2  }
   0xe   : > { %s3461_s21 = smov (!%p407_p6, %s2574_s21), 1  ;;  %702 = vperm.xlu0 %2768, %v699_v4   ;;  %v2920_v6 = vld [vmem:[%s3458_s10] sm:$0xf]  ;;  %v469_v8 = vld [vmem:[#allocation2 + $0x70] sm:$0xff]  ;;  %501 = vmatpush.msra.mxu1 %v486_v5  ;;  %v485_v13 = vld [vmem:[#allocation2 + $0xe8] sm:$0xff]  ;;  %s2817_s25 = smov 18  }
   0xf   : > { %s2900_s26 = sshll.u32 %s3461_s21, 3  ;;  %v487_v7 = vld [vmem:[#allocation2 + $0xf8] sm:$0xff]  ;;  %v972_v9 = vperm.slane %v2920_v6, 3  ;;  %v737_v10 = vperm.slane %v2920_v6, 0  ;;  %v971_v14 = vperm.slane %v2920_v6, 1  ;;  %543 = vmatpush.msra.mxu3 %v469_v8  ;;  %v467_v15 = vld [vmem:[#allocation2 + $0x60] sm:$0xff] }
  0x10   : > { %s410_s29 = scalar_lea.vmem %s3448_s0, %s2900_s26  ;;  %s415_s13 = scalar_lea.vmem %s3449_s1, %s2900_s26  ;;  %521 = vmatpush.msra.mxu2 %v487_v7  ;;  %v470_v11 = vld [vmem:[#allocation2 + $0x78] sm:$0xff]  ;;  %v468_v16 = vld [vmem:[#allocation2 + $0x68] sm:$0xff]  ;;  %502 = vmatpush.msra.mxu1 %v484_v12  ;;  %v482_v19 = vld [vmem:[#allocation2 + $0xd0] sm:$0xff]  ;;  %v738_v46 = vperm.slane %v2920_v6, 2  ;;  %vm490_vm1 = vcmask 523264   ;;  %vm716_vm2 = vcmask 138240  }
  0x11   : > { %v422_v1 = vld [vmem:[%s410_s29] sm:$0xff]  ;;  %v2925_v17 = vperm.slane %v737_v10, 0  ;;  %v2927_v18 = vperm.slane %v971_v14, 1  ;;  %v2929_v21 = vperm.slane %v972_v9, 1  ;;  %544 = vmatpush.msra.mxu3 %v467_v15  ;;  %v465_v22 = vld [vmem:[#allocation2 + $0x50] sm:$0xff]  ;;  %v424_v24 = vld [vmem:[%s3450_s2 + $0x8] sm:$0xff] }
  0x12   : > { %v707_v2 = vld [vmem:[%s415_s13] sm:$0xff]  ;;  %447 = vmatpush.msra.mxu0 %v422_v1  ;;  %522 = vmatpush.msra.mxu2 %v485_v13  ;;  %v480_v25 = vld [vmem:[#allocation2 + $0xc0] sm:$0xff]  ;;  %v481_v26 = vld [vmem:[#allocation2 + $0xc8] sm:$0xff]  ;;  %s2818_s27 = smov 17   ;;  %v2943_v55 = vperm.slane %v738_v46, 0  ;;  %s2819_s28 = smov 34  }
  0x13   : > { %709 = vst [vmem:[#allocation1] ss:$2 sm:$0xff] %v707_v2  ;;  %2586 = vmatmul.msk.f32.vlgmr.msra.gmra.mxu0 %vm425_vm0, %v423_v3  ;;  %v483_v20 = vld [vmem:[#allocation2 + $0xd8] sm:$0xff]  ;;  %1119 = vrot.lane.b32.xlu1 %v2925_v17, %s2815_s23  ;;  %v463_v27 = vld [vmem:[#allocation2 + $0x40] sm:$0xff]  ;;  %v464_v28 = vld [vmem:[#allocation2 + $0x48] sm:$0xff]  ;;  %s2820_s29 = smov 32  }
  0x14   : > { %563 = vmatpush.msrb.mxu0 %v470_v11  ;;  %v466_v23 = vld [vmem:[#allocation2 + $0x58] sm:$0xff]  ;;  %979 = vrot.lane.b32.xlu2 %v2927_v18, %s2816_s24  ;;  %v478_v29 = vld [vmem:[#allocation2 + $0xb0] sm:$0xff]  ;;  %v476_v33 = vld [vmem:[#allocation2 + $0xa0] sm:$0xff]  ;;  %s2821_s30 = smov 127   ;;  %s2822_s12 = smov 111   ;;  %vm983_vm3 = vcmask 15360  }
  0x15   : > { %503 = vmatpush.msra.mxu1 %v482_v19  ;;  %523 = vmatpush.msra.mxu2 %v483_v20  ;;  %v479_v30 = vld [vmem:[#allocation2 + $0xb8] sm:$0xff]  ;;  %v461_v31 = vld [vmem:[#allocation2 + $0x30] sm:$0xff]  ;;  %v477_v34 = vld [vmem:[#allocation2 + $0xa8] sm:$0xff]  ;;  %s2823_s13 = smov 112   ;;  %s2824_s14 = smov 126   ;;  %vm1123_vm4 = vcmask 130048  }
  0x16   : > { %564 = vmatpush.msrb.mxu0 %v468_v16  ;;  %545 = vmatpush.msra.mxu3 %v465_v22  ;;  %v462_v32 = vld [vmem:[#allocation2 + $0x38] sm:$0xff]  ;;  %v459_v35 = vld [vmem:[#allocation2 + $0x20] sm:$0xff]  ;;  %v460_v36 = vld [vmem:[#allocation2 + $0x28] sm:$0xff]  ;;  %vm1378_vm5 = vcmask 146432   ;;  %s2825_s15 = smov 110   ;;  %vm752_vm6 = vcmask 1043456  }
  0x17   : > { %981 = vrot.lane.b32.xlu0 %v2929_v21, %s2816_s24  ;;  %504 = vmatpush.msra.mxu1 %v480_v25  ;;  %v474_v37 = vld [vmem:[#allocation2 + $0x90] sm:$0xff]  ;;  %v475_v39 = vld [vmem:[#allocation2 + $0x98] sm:$0xff]  ;;  %v472_v42 = vld [vmem:[#allocation2 + $0x80] sm:$0xff]  ;;  %vm860_vm7 = vcmask 1039360   ;;  %vm748_vm8 = vcmask 31744   ;;  %vm1005_vm9 = vcmask 1031168  }
  0x18   : > { %565 = vmatpush.msrb.mxu0 %v466_v23  ;;  %524 = vmatpush.msra.mxu2 %v481_v26  ;;  %v457_v40 = vld [vmem:[#allocation2 + $0x10] sm:$0xff]  ;;  %v458_v41 = vld [vmem:[#allocation2 + $0x18] sm:$0xff]  ;;  %v473_v43 = vld [vmem:[#allocation2 + $0x88] sm:$0xff]  ;;  %vm1265_vm10 = vcmask 908288   ;;  %vm1145_vm11 = vcmask 916480   ;;  %vm1400_vm12 = vcmask 900096  }
  0x19   : > { %546 = vmatpush.msra.mxu3 %v463_v27  ;;  %505 = vmatpush.msra.mxu1 %v478_v29  ;;  %v455_v44 = vld [vmem:[#allocation2] sm:$0xff]  ;;  %v456_v45 = vld [vmem:[#allocation2 + $0x8] sm:$0xff]  ;;  %v590_v47 = vld [vmem:[#allocation2 + $0x170] sm:$0xff]  ;;  %vm1516_vm13 = vcmask 261120   ;;  %vm1771_vm14 = vcmask 277504   ;;  %vm1538_vm15 = vcmask 785408  }
  0x1a   : > { %566 = vmatpush.msrb.mxu0 %v464_v28  ;;  %525 = vmatpush.msra.mxu2 %v479_v30  ;;  %v710_v38 = vld.sshfl [vmem:[#allocation1] sm:$0xff pattern:$0x75316420]  ;;  %v711_v49 = vld.sshfl [vmem:[#allocation1 + $0x8] sm:$0xff pattern:$0x75316420] }
  0x1b   : > { %2587 = vmatmul.msk.f32.gmra.mxu0 %vm425_vm0, %v424_v24  ;;  %547 = vmatpush.msra.mxu3 %v461_v31  ;;  %v591_v48 = vld [vmem:[#allocation2 + $0x178] sm:$0xff]  ;;  %v652_v50 = vld [vmem:[#allocation2 + $0x1f0] sm:$0xff]  ;;  %v588_v52 = vld [vmem:[#allocation2 + $0x160] sm:$0xff]  ;;  %vm1658_vm0 = vcmask 777216  }
  0x1c   : > { %567 = vmatpush.msrb.mxu0 %v462_v32  ;;  %1376 = vrot.lane.b32.xlu1 %v2929_v21, %s2817_s25  ;;  %v653_v51 = vld [vmem:[#allocation2 + $0x1f8] sm:$0xff]  ;;  %v589_v53 = vld [vmem:[#allocation2 + $0x168] sm:$0xff]  ;;  %v650_v54 = vld [vmem:[#allocation2 + $0x1e0] sm:$0xff] }
  0x1d   : > { %506 = vmatpush.msra.mxu1 %v476_v33  ;;  %526 = vmatpush.msra.mxu2 %v477_v34  ;;  %v651_v56 = vld [vmem:[#allocation2 + $0x1e8] sm:$0xff]  ;;  %v586_v57 = vld [vmem:[#allocation2 + $0x150] sm:$0xff]  ;;  %v587_v58 = vld [vmem:[#allocation2 + $0x158] sm:$0xff] }
  0x1e   : > { %548 = vmatpush.msra.mxu3 %v459_v35  ;;  %568 = vmatpush.msrb.mxu0 %v460_v36  ;;  %v648_v59 = vld [vmem:[#allocation2 + $0x1d0] sm:$0xff]  ;;  %v649_v60 = vld [vmem:[#allocation2 + $0x1d8] sm:$0xff]  ;;  %v584_v61 = vld [vmem:[#allocation2 + $0x140] sm:$0xff] }
  0x1f   : > { %507 = vmatpush.msra.mxu1 %v474_v37  ;;  %712 = vrot.lane.b32.xlu0 %v710_v38, %s2818_s27  ;;  %v585_v62 = vld [vmem:[#allocation2 + $0x148] sm:$0xff]  ;;  %v646_v63 = vld [vmem:[#allocation2 + $0x1c0] sm:$0xff]  ;;  %v582_v1 = vld [vmem:[#allocation2 + $0x130] sm:$0xff] }
  0x20   : > { %527 = vmatpush.msra.mxu2 %v475_v39  ;;  %549 = vmatpush.msra.mxu3 %v457_v40  ;;  %v647_v0 = vld [vmem:[#allocation2 + $0x1c8] sm:$0xff]  ;;  %v583_v2 = vld [vmem:[#allocation2 + $0x138] sm:$0xff]  ;;  %v644_v3 = vld [vmem:[#allocation2 + $0x1b0] sm:$0xff] }
  0x21   : > { %569 = vmatpush.msrb.mxu0 %v458_v41  ;;  %508 = vmatpush.msra.mxu1 %v472_v42  ;;  %v645_v4 = vld [vmem:[#allocation2 + $0x1b8] sm:$0xff]  ;;  %v580_v5 = vld [vmem:[#allocation2 + $0x120] sm:$0xff]  ;;  %v581_v6 = vld [vmem:[#allocation2 + $0x128] sm:$0xff] }
  0x22   : > { %528 = vmatpush.msra.mxu2 %v473_v43  ;;  %550 = vmatpush.msra.mxu3 %v455_v44  ;;  %v642_v7 = vld [vmem:[#allocation2 + $0x1a0] sm:$0xff]  ;;  %v643_v8 = vld [vmem:[#allocation2 + $0x1a8] sm:$0xff]  ;;  %v578_v9 = vld [vmem:[#allocation2 + $0x110] sm:$0xff] }
  0x23   : > { %570 = vmatpush.msrb.mxu0 %v456_v45  ;;  %603 = vmatpush.msrb.mxu1 %v590_v47  ;;  %v579_v10 = vld [vmem:[#allocation2 + $0x118] sm:$0xff]  ;;  %v640_v11 = vld [vmem:[#allocation2 + $0x190] sm:$0xff]  ;;  %v576_v13 = vld [vmem:[#allocation2 + $0x100] sm:$0xff] }
  0x24   : > { %623 = vmatpush.msrb.mxu2 %v591_v48  ;;  %714 = vrot.lane.b32.xlu1 %v711_v49, %s2818_s27  ;;  %v641_v12 = vld [vmem:[#allocation2 + $0x198] sm:$0xff]  ;;  %v577_v14 = vld [vmem:[#allocation2 + $0x108] sm:$0xff]  ;;  %v638_v15 = vld [vmem:[#allocation2 + $0x180] sm:$0xff] }
  0x25   : > { %665 = vmatpush.msrb.mxu3 %v652_v50  ;;  %685 = vmatpush.msra.mxu0 %v653_v51  ;;  %v639_v16 = vld [vmem:[#allocation2 + $0x188] sm:$0xff]  ;;  %v735_v51 = vld [vmem:[%s3453_s5] sm:$0xf] }
  0x26   : > { %604 = vmatpush.msrb.mxu1 %v588_v52  ;;  %624 = vmatpush.msrb.mxu2 %v589_v53 }
  0x27   : > { %666 = vmatpush.msrb.mxu3 %v650_v54  ;;  %686 = vmatpush.msra.mxu0 %v651_v56 }
  0x28   : > { %1121 = vrot.lane.b32.xlu2 %v2943_v55, %s2815_s23  ;;  %1374 = vrot.lane.b32.xlu0 %v2927_v18, %s2817_s25  ;;  %s2826_s25 = smov 96  }
  0x29   : > { %605 = vmatpush.msrb.mxu1 %v586_v57  ;;  %625 = vmatpush.msrb.mxu2 %v587_v58 }
  0x2a   : > { %667 = vmatpush.msrb.mxu3 %v648_v59  ;;  %687 = vmatpush.msra.mxu0 %v649_v60 }
  0x2b   : > { %606 = vmatpush.msrb.mxu1 %v584_v61  ;;  %626 = vmatpush.msrb.mxu2 %v585_v62 }
  0x2c   : > { %1767 = vrot.lane.b32.xlu1 %v2927_v18, %s2819_s28  ;;  %668 = vmatpush.msrb.mxu3 %v646_v63 }
  0x2d   : > { %688 = vmatpush.msra.mxu0 %v647_v0  ;;  %607 = vmatpush.msrb.mxu1 %v582_v1  ;;  %v2604_v0 = vld [vmem:[%s3453_s5 + $0x4] sm:$0xf] }
  0x2e   : > { %627 = vmatpush.msrb.mxu2 %v583_v2  ;;  %669 = vmatpush.msrb.mxu3 %v644_v3 }
  0x2f   : > { %689 = vmatpush.msra.mxu0 %v645_v4  ;;  %608 = vmatpush.msrb.mxu1 %v580_v5 }
  0x30   : > { %1512 = vrot.lane.b32.xlu2 %v2925_v17, %s2820_s29  ;;  %1514 = vrot.lane.b32.xlu0 %v2943_v55, %s2820_s29  ;;  %s2828_s29 = smov 94  }
  0x31   : > { %628 = vmatpush.msrb.mxu2 %v581_v6  ;;  %670 = vmatpush.msrb.mxu3 %v642_v7 }
  0x32   : > { %690 = vmatpush.msra.mxu0 %v643_v8  ;;  %609 = vmatpush.msrb.mxu1 %v578_v9 }
  0x33   : > { %629 = vmatpush.msrb.mxu2 %v579_v10  ;;  %671 = vmatpush.msrb.mxu3 %v640_v11 }
  0x34   : > { %691 = vmatpush.msra.mxu0 %v641_v12  ;;  %610 = vmatpush.msrb.mxu1 %v576_v13 }
  0x35   : > { %630 = vmatpush.msrb.mxu2 %v577_v14  ;;  %672 = vmatpush.msrb.mxu3 %v638_v15  ;;  %v2614_v15 = vld [vmem:[%s3453_s5 + $0x8] sm:$0xf] }
  0x36   : > { %692 = vmatpush.msra.mxu0 %v639_v16 }
  0x38   : > { %1769 = vrot.lane.b32.xlu2 %v2929_v21, %s2819_s28  ;;  %s2827_s28 = smov 95  }
  0x6e   : > { %v2983_v31 = vpop.permute.xlu2 %979 }
  0x80   : > { %v2954_v18 = vpop.permute.xlu0 %702 }
  0x82   : > { %v3006_v37 = vpop.permute.xlu2 %1121 }
  0x85   : > { %v2956_v19 = vpop.permute.xlu1 %1119 }
  0x86   : > { %v3011_v38 = vsel %vm1123_vm4, %v2956_v19, %v3006_v37 }
  0x89   : > { %v2958_v20 = vpop.permute.xlu0 %981 }
  0x8a   : > { %v2989_v32 = vsel %vm983_vm3, %v2983_v31, %v2958_v20  ;;  %v3049_v1 = vpop.permute.xlu2 %1512 }
  0x8e   : > { %v2962_v23 = vpop.permute.xlu1 %1376 }
  0x90   : > { %v449_v21 = vpop.f32.mrf.mxu0 }
  0x91   : > { %v489_v22 = vrot.slane %v449_v21, 4  ;;  %2590 = vmatmul.msk.f32.vlgmr.msra.gmra.mxu3 %vm490_vm1, %v449_v21  ;;  %2591 = vmatmul.msk.f32.vlgmr.msrb.gmra.mxu0 %vm490_vm1, %v449_v21  ;;  %v713_v24 = vpop.permute.xlu0 %712 }
  0x92   : > { %v2967_v25 = vsel %vm716_vm2, 0.0, %v713_v24  ;;  %v3058_v10 = vpop.permute.xlu2 %1769 }
  0x93   : > { %2588 = vmatmul.msk.f32.vlgmr.msra.gmra.mxu1 %vm490_vm1, %v489_v22  ;;  %2589 = vmatmul.msk.f32.vlgmr.msra.gmra.mxu2 %vm490_vm1, %v489_v22  ;;  %v1128_v33 = vmul.f32 %v2956_v19, %v2967_v25  ;;  %v988_v35 = vmul.f32 %v2983_v31, %v2967_v25  ;;  %v743_v44 = vmul.f32 %v2925_v17, %v2967_v25 }
  0x94   : > { %912 = vrot.lane.b32.xlu0 %v2967_v25, %s2821_s30  ;;  %1315 = vrot.lane.b32.xlu2 %v2967_v25, %s2822_s12 }
  0x95   : > { %2600 = vmatpush.msk.msra.mxu3 %vm752_vm6, %v743_v44 }
  0x96   : > { %v715_v28 = vpop.permute.xlu1 %714 }
  0x97   : > { %v2978_v29 = vsel %vm716_vm2, %v713_v24, %v715_v28  ;;  %v2981_v30 = vsel %vm716_vm2, %v715_v28, 0.0 }
  0x98   : > { %v452_v26 = vpop.f32.mrf.mxu0  ;;  %914 = vrot.lane.b32.xlu1 %v2978_v29, %s2821_s30  ;;  %v989_v34 = vmul.f32 %v2989_v32, %v2978_v29  ;;  %v990_v36 = vmul.f32 %v2958_v20, %v2981_v30  ;;  %v1129_v39 = vmul.f32 %v3011_v38, %v2978_v29  ;;  %v1130_v43 = vmul.f32 %v3006_v37, %v2981_v30 }
  0x99   : > { %v654_v27 = vrot.slane %v452_v26, 4  ;;  %v744_v45 = vmul.f32 %v2943_v55, %v2978_v29 }
  0x9a   : > { %v3015_v40 = vpop.permute.xlu0 %1374 }
  0x9b   : > { %2592 = vmatmul.msk.f32.vlgmr.msrb.gmra.mxu1 %vm490_vm1, %v452_v26  ;;  %2593 = vmatmul.msk.f32.vlgmr.msrb.gmra.mxu2 %vm490_vm1, %v452_v26  ;;  %v3020_v41 = vsel %vm1378_vm5, %v3015_v40, %v2962_v23  ;;  %v1383_v16 = vmul.f32 %v3015_v40, %v2967_v25 }
  0x9c   : > { %2594 = vmatmul.msk.f32.vlgmr.msrb.gmra.mxu3 %vm490_vm1, %v654_v27  ;;  %2595 = vmatmul.msk.f32.vlgmr.msra.gmra.mxu0 %vm490_vm1, %v654_v27  ;;  %v1384_v42 = vmul.f32 %v3020_v41, %v2978_v29  ;;  %vm1793_vm1 = vcmask 769024  }
  0x9d   : > { %916 = vrot.lane.b32.xlu0 %v2981_v30, %s2821_s30  ;;  %1198 = vrot.lane.b32.xlu2 %v1128_v33, %s2823_s13 }
  0x9e   : > { %2602 = vmatpush.msk.msrb.mxu0 %vm752_vm6, %v744_v45  ;;  %v3036_v47 = vpop.permute.xlu1 %1767 }
  0xa0   : > { %1060 = vrot.lane.b32.xlu1 %v989_v34, %s2824_s14  ;;  %v2624_v34 = vld [vmem:[%s3453_s5 + $0xc] sm:$0xf] }
  0xa2   : > { %v3034_v46 = vpop.permute.xlu0 %1514 }
  0xa4   : > { %2601 = vmatmul.msk.f32.vlgmr.msra.gmra.mxu3 %vm748_vm8, %v735_v51  ;;  %2603 = vmatmul.msk.f32.vlgmr.msrb.gmra.mxu0 %vm748_vm8, %v735_v51 }
  0xa5   : > { %1317 = vrot.lane.b32.xlu0 %v2978_v29, %s2822_s12  ;;  %1202 = vrot.lane.b32.xlu2 %v1130_v43, %s2823_s13 }
  0xad   : > { %1058 = vrot.lane.b32.xlu0 %v988_v35, %s2824_s14 }
  0xb5   : > { %1062 = vrot.lane.b32.xlu0 %v990_v36, %s2824_s14 }
  0xbd   : > { %1200 = vrot.lane.b32.xlu0 %v1129_v39, %s2823_s13 }
  0xc5   : > { %1455 = vrot.lane.b32.xlu0 %v1384_v42, %s2825_s15 }
  0xee   : > { %v1316_v14 = vpop.permute.xlu2 %1315 }
  0xf7   : > { %v1199_v22 = vpop.permute.xlu2 %1198 }
  0xff   : > { %v1203_v28 = vpop.permute.xlu2 %1202 }
 0x106   : > { %v913_v49 = vpop.permute.xlu0 %912 }
 0x10a   : > { %v915_v50 = vpop.permute.xlu1 %914 }
 0x10b   : > { %v918_v53 = vsel %vm860_vm7, %v913_v49, %v915_v50 }
 0x10c   : > { %2610 = vmatpush.msk.msrb.mxu3 %vm752_vm6, %v918_v53 }
 0x10d   : > { %2611 = vmatmul.msk.f32.vlgmr.msrb.gmra.mxu3 %vm748_vm8, %v2604_v0 }
 0x10e   : > { %v572_v56 = vpop.f32.mrf.mxu0 }
 0x10f   : > { %v917_v60 = vpop.permute.xlu0 %916 }
 0x110   : > { %v510_v48 = vpop.f32.mrf.mxu1  ;;  %v919_v63 = vsel %vm860_vm7, %v915_v50, %v917_v60  ;;  %v1385_v60 = vmul.f32 %v2962_v23, %v2981_v30 }
 0x111   : > { %2612 = vmatpush.msk.msra.mxu0 %vm752_vm6, %v919_v63 }
 0x112   : > { %2613 = vmatmul.msk.f32.vlgmr.msra.gmra.mxu0 %vm748_vm8, %v2604_v0  ;;  %v1061_v11 = vpop.permute.xlu1 %1060 }
 0x114   : > { %v552_v54 = vpop.f32.mrf.mxu3 }
 0x115   : > { %v553_v58 = vadd.f32 %v552_v54, %v510_v48 }
 0x116   : > { %v530_v52 = vpop.f32.mrf.mxu2 }
 0x117   : > { %v573_v59 = vadd.f32 %v572_v56, %v530_v52  ;;  %v1318_v9 = vpop.permute.xlu0 %1317  ;;  %v3108_v52 = vsel %vm1516_vm13, %v3049_v1, %v3034_v46 }
 0x118   : > { %v612_v57 = vpop.f32.mrf.mxu1  ;;  %v1321_v24 = vsel %vm1265_vm10, %v1316_v14, %v1318_v9  ;;  %v1522_v54 = vmul.f32 %v3108_v52, %v2978_v29 }
 0x119   : > { %v635_v61 = vadd.f32 %v612_v57, %v553_v58  ;;  %v694_v4 = vpop.f32.mrf.mxu0 }
 0x11e   : > { %v632_v62 = vpop.f32.mrf.mxu2 }
 0x11f   : > { %v636_v2 = vadd.f32 %v632_v62, %v573_v59  ;;  %v674_v3 = vpop.f32.mrf.mxu3  ;;  %v1059_v12 = vpop.permute.xlu0 %1058  ;;  %v1521_v62 = vmul.f32 %v3049_v1, %v2967_v25 }
 0x120   : > { %v697_v5 = vadd.f32 %v674_v3, %v635_v61  ;;  %v1064_v13 = vsel %vm1005_vm9, %v1059_v12, %v1061_v11 }
 0x121   : > { %v698_v6 = vadd.f32 %v694_v4, %v636_v2  ;;  %2620 = vmatpush.msk.msra.mxu3 %vm752_vm6, %v1064_v13  ;;  %v1523_v2 = vmul.f32 %v3034_v46, %v2981_v30 }
 0x122   : > { %v705_v7 = vadd.f32 %v2954_v18, %v697_v5  ;;  %2621 = vmatmul.msk.f32.vlgmr.msra.gmra.mxu3 %vm748_vm8, %v2614_v15  ;;  %v3153_v5 = vsel %vm1771_vm14, %v3036_v47, %v3058_v10 }
 0x123   : > { %v706_v8 = vadd.f32 %v2954_v18, %v698_v6 }
 0x124   : > { %725 = vrot.lane.b32.xlu1 %v705_v7, %s2818_s27 }
 0x125   : > { %727 = vrot.lane.b32.xlu2 %v706_v8, %s2818_s27  ;;  %v1777_v8 = vmul.f32 %v3153_v5, %v2978_v29 }
 0x127   : > { %v1063_v18 = vpop.permute.xlu0 %1062 }
 0x128   : > { %v1065_v21 = vsel %vm1005_vm9, %v1061_v11, %v1063_v18  ;;  %v1903_v11 = vld [vmem:[%s3455_s7] sm:$0xf] }
 0x129   : > { %2622 = vmatpush.msk.msrb.mxu0 %vm752_vm6, %v1065_v21  ;;  %v745_v21 = vld [vmem:[%s3454_s6] sm:$0xf] }
 0x12a   : > { %2623 = vmatmul.msk.f32.vlgmr.msrb.gmra.mxu0 %vm748_vm8, %v2614_v15 }
 0x12d   : > { %1319 = vrot.lane.b32.xlu2 %v2981_v30, %s2822_s12 }
 0x12f   : > { %v1201_v26 = vpop.permute.xlu0 %1200 }
 0x130   : > { %v1204_v27 = vsel %vm1145_vm11, %v1199_v22, %v1201_v26  ;;  %v1205_v33 = vsel %vm1145_vm11, %v1201_v26, %v1203_v28 }
 0x131   : > { %2630 = vmatpush.msk.msrb.mxu3 %vm752_vm6, %v1204_v27  ;;  %2632 = vmatpush.msk.msra.mxu0 %vm752_vm6, %v1205_v33  ;;  %v2644_v27 = vld [vmem:[%s3453_s5 + $0x14] sm:$0xf] }
 0x132   : > { %2631 = vmatmul.msk.f32.vlgmr.msrb.gmra.mxu3 %vm748_vm8, %v2624_v34  ;;  %2633 = vmatmul.msk.f32.vlgmr.msra.gmra.mxu0 %vm748_vm8, %v2624_v34  ;;  %v2605_v34 = vld [vmem:[%s3454_s6 + $0x4] sm:$0xf] }
 0x133   : > { %2640 = vmatpush.msk.msra.mxu3 %vm752_vm6, %v1321_v24 }
 0x135   : > { %1453 = vrot.lane.b32.xlu2 %v1383_v16, %s2825_s15  ;;  %v2634_v16 = vld [vmem:[%s3453_s5 + $0x10] sm:$0xf] }
 0x137   : > { %v3087_v42 = vpop.permute.xlu0 %1455 }
 0x13a   : > { %2641 = vmatmul.msk.f32.vlgmr.msra.gmra.mxu3 %vm748_vm8, %v2634_v16 }
 0x17f   : > { %v728_v35 = vpop.permute.xlu2 %727 }
 0x180   : > { %v734_v53 = vsel %vm716_vm2, %v728_v35, 0.0 }
 0x181   : > { %v995_v58 = vmul.f32 %v2958_v20, %v734_v53  ;;  %v1135_v6 = vmul.f32 %v3006_v37, %v734_v53  ;;  %v1390_v12 = vmul.f32 %v2962_v23, %v734_v53  ;;  %v1528_v13 = vmul.f32 %v3034_v46, %v734_v53 }
 0x182   : > { %v1783_v14 = vmul.f32 %v3058_v10, %v734_v53 }
 0x187   : > { %v1320_v36 = vpop.permute.xlu2 %1319 }
 0x188   : > { %v1322_v39 = vsel %vm1265_vm10, %v1318_v9, %v1320_v36  ;;  %v1776_v9 = vmul.f32 %v3036_v47, %v2967_v25 }
 0x189   : > { %2642 = vmatpush.msk.msrb.mxu0 %vm752_vm6, %v1322_v39 }
 0x18a   : > { %2643 = vmatmul.msk.f32.vlgmr.msrb.gmra.mxu0 %vm748_vm8, %v2634_v16 }
 0x18f   : > { %v1454_v43 = vpop.permute.xlu2 %1453 }
 0x190   : > { %v1459_v44 = vsel %vm1400_vm12, %v1454_v43, %v3087_v42 }
 0x191   : > { %2650 = vmatpush.msk.msrb.mxu3 %vm752_vm6, %v1459_v44 }
 0x192   : > { %2651 = vmatmul.msk.f32.vlgmr.msrb.gmra.mxu3 %vm748_vm8, %v2644_v27 }
 0x196   : > { %v726_v45 = vpop.permute.xlu1 %725 }
 0x197   : > { %v729_v48 = vsel %vm716_vm2, %v726_v45, %v728_v35  ;;  %v3094_v49 = vsel %vm716_vm2, 0.0, %v726_v45 }
 0x198   : > { %1259 = vrot.lane.b32.xlu1 %v3094_v49, %s2822_s12  ;;  %854 = vrot.lane.b32.xlu2 %v3094_v49, %s2821_s30  ;;  %v746_v50 = vmul.f32 %v2925_v17, %v3094_v49  ;;  %v747_v51 = vmul.f32 %v2943_v55, %v729_v48  ;;  %v993_v56 = vmul.f32 %v2983_v31, %v3094_v49 }
 0x199   : > { %1261 = vrot.lane.b32.xlu0 %v729_v48, %s2822_s12  ;;  %v1133_v57 = vmul.f32 %v2956_v19, %v3094_v49  ;;  %v1134_v59 = vmul.f32 %v3011_v38, %v729_v48  ;;  %v1388_v61 = vmul.f32 %v3015_v40, %v3094_v49  ;;  %v994_v63 = vmul.f32 %v2989_v32, %v729_v48 }
 0x19a   : > { %2596 = vmatpush.msk.msra.mxu1 %vm752_vm6, %v746_v50  ;;  %2598 = vmatpush.msk.msra.mxu2 %vm752_vm6, %v747_v51  ;;  %v1389_v0 = vmul.f32 %v3020_v41, %v729_v48  ;;  %v1526_v3 = vmul.f32 %v3049_v1, %v3094_v49  ;;  %v1527_v4 = vmul.f32 %v3108_v52, %v729_v48 }
 0x19b   : > { %v1782_v7 = vmul.f32 %v3153_v5, %v729_v48  ;;  %2597 = vmatmul.msk.f32.vlgmr.msra.gmra.mxu1 %vm748_vm8, %v745_v21  ;;  %2599 = vmatmul.msk.f32.vlgmr.msra.gmra.mxu2 %vm748_vm8, %v745_v21 }
 0x1a0   : > { %858 = vrot.lane.b32.xlu2 %v734_v53, %s2821_s30  ;;  %856 = vrot.lane.b32.xlu1 %v729_v48, %s2821_s30 }
 0x1a1   : > { %1593 = vrot.lane.b32.xlu0 %v1522_v54, %s2826_s25 }
 0x1a8   : > { %999 = vrot.lane.b32.xlu2 %v993_v56, %s2824_s14  ;;  %1139 = vrot.lane.b32.xlu1 %v1133_v57, %s2823_s13 }
 0x1a9   : > { %1654 = vrot.lane.b32.xlu0 %v729_v48, %s2827_s28 }
 0x1b0   : > { %1003 = vrot.lane.b32.xlu2 %v995_v58, %s2824_s14  ;;  %1263 = vrot.lane.b32.xlu1 %v734_v53, %s2822_s12 }
 0x1b1   : > { %1141 = vrot.lane.b32.xlu0 %v1134_v59, %s2823_s13  ;;  %v2654_v59 = vld [vmem:[%s3453_s5 + $0x18] sm:$0xf] }
 0x1b8   : > { %1457 = vrot.lane.b32.xlu2 %v1385_v60, %s2825_s15  ;;  %1394 = vrot.lane.b32.xlu1 %v1388_v61, %s2825_s15 }
 0x1b9   : > { %1710 = vrot.lane.b32.xlu0 %v2978_v29, %s2827_s28  ;;  %v1778_v29 = vmul.f32 %v3058_v10, %v2981_v30 }
 0x1c0   : > { %1591 = vrot.lane.b32.xlu2 %v1521_v62, %s2826_s25  ;;  %1001 = vrot.lane.b32.xlu1 %v994_v63, %s2824_s14  ;;  %v2615_v62 = vld [vmem:[%s3454_s6 + $0x8] sm:$0xf] }
 0x1c1   : > { %1396 = vrot.lane.b32.xlu0 %v1389_v0, %s2825_s15 }
 0x1c8   : > { %1595 = vrot.lane.b32.xlu2 %v1523_v2, %s2826_s25  ;;  %1532 = vrot.lane.b32.xlu1 %v1526_v3, %s2826_s25 }
 0x1c9   : > { %1534 = vrot.lane.b32.xlu0 %v1527_v4, %s2826_s25 }
 0x1d0   : > { %1708 = vrot.lane.b32.xlu2 %v2967_v25, %s2827_s28  ;;  %1143 = vrot.lane.b32.xlu1 %v1135_v6, %s2823_s13 }
 0x1d1   : > { %1789 = vrot.lane.b32.xlu0 %v1782_v7, %s2828_s29 }
 0x1d8   : > { %1712 = vrot.lane.b32.xlu2 %v2981_v30, %s2827_s28  ;;  %1656 = vrot.lane.b32.xlu1 %v734_v53, %s2827_s28  ;;  %v1781_v30 = vmul.f32 %v3036_v47, %v3094_v49 }
 0x1d9   : > { %1848 = vrot.lane.b32.xlu0 %v1777_v8, %s2828_s29  ;;  %v2625_v8 = vld [vmem:[%s3454_s6 + $0xc] sm:$0xf] }
 0x1e0   : > { %1846 = vrot.lane.b32.xlu2 %v1776_v9, %s2828_s29  ;;  %1398 = vrot.lane.b32.xlu1 %v1390_v12, %s2825_s15  ;;  %v2664_v12 = vld [vmem:[%s3453_s5 + $0x1c] sm:$0xf] }
 0x1e1   : > { %1906 = vperm.xlu0 %2768, %v1903_v11  }
 0x1e8   : > { %1850 = vrot.lane.b32.xlu2 %v1778_v29, %s2828_s29  ;;  %1536 = vrot.lane.b32.xlu1 %v1528_v13, %s2826_s25 }
 0x1f0   : > { %1652 = vrot.lane.b32.xlu1 %v3094_v49, %s2827_s28 }
 0x1f2   : > { %v855_v25 = vpop.permute.xlu2 %854 }
 0x1f8   : > { %1791 = vrot.lane.b32.xlu1 %v1783_v14, %s2828_s29 }
 0x1fa   : > { %v859_v15 = vpop.permute.xlu2 %858 }
 0x200   : > { %1787 = vrot.lane.b32.xlu1 %v1781_v30, %s2828_s29 }
 0x202   : > { %v1000_v18 = vpop.permute.xlu2 %999 }
 0x20a   : > { %v1260_v22 = vpop.permute.xlu1 %1259  ;;  %v1004_v24 = vpop.permute.xlu2 %1003 }
 0x20b   : > { %v3197_v26 = vpop.permute.xlu0 %1261 }
 0x20c   : > { %v1266_v6 = vsel %vm1265_vm10, %v1260_v22, %v3197_v26 }
 0x212   : > { %v1458_v28 = vpop.permute.xlu2 %1457  ;;  %v857_v33 = vpop.permute.xlu1 %856 }
 0x213   : > { %v1460_v35 = vsel %vm1400_vm12, %v3087_v42, %v1458_v28  ;;  %v1594_v36 = vpop.permute.xlu0 %1593  ;;  %v861_v39 = vsel %vm860_vm7, %v855_v25, %v857_v33  ;;  %v862_v43 = vsel %vm860_vm7, %v857_v33, %v859_v15  ;;  %v2635_v25 = vld [vmem:[%s3454_s6 + $0x10] sm:$0xf]  ;;  %v2674_v28 = vld [vmem:[%s3453_s5 + $0x20] sm:$0xf] }
 0x214   : > { %2606 = vmatpush.msk.msrb.mxu1 %vm752_vm6, %v861_v39  ;;  %2608 = vmatpush.msk.msrb.mxu2 %vm752_vm6, %v862_v43 }
 0x215   : > { %2652 = vmatpush.msk.msra.mxu0 %vm752_vm6, %v1460_v35  ;;  %2607 = vmatmul.msk.f32.vlgmr.msrb.gmra.mxu1 %vm748_vm8, %v2605_v34  ;;  %v2655_v35 = vld [vmem:[%s3454_s6 + $0x18] sm:$0xf] }
 0x216   : > { %2653 = vmatmul.msk.f32.vlgmr.msra.gmra.mxu0 %vm748_vm8, %v2644_v27  ;;  %2609 = vmatmul.msk.f32.vlgmr.msrb.gmra.mxu2 %vm748_vm8, %v2605_v34 }
 0x21a   : > { %v1592_v44 = vpop.permute.xlu2 %1591  ;;  %v1140_v42 = vpop.permute.xlu1 %1139 }
 0x21b   : > { %v1597_v45 = vsel %vm1538_vm15, %v1592_v44, %v1594_v36  ;;  %v3217_v48 = vpop.permute.xlu0 %1654 }
 0x21c   : > { %2660 = vmatpush.msk.msra.mxu3 %vm752_vm6, %v1597_v45 }
 0x21d   : > { %2661 = vmatmul.msk.f32.vlgmr.msra.gmra.mxu3 %vm748_vm8, %v2654_v59 }
 0x222   : > { %v1596_v49 = vpop.permute.xlu2 %1595  ;;  %v1264_v50 = vpop.permute.xlu1 %1263 }
 0x223   : > { %v1598_v51 = vsel %vm1538_vm15, %v1594_v36, %v1596_v49  ;;  %v1142_v53 = vpop.permute.xlu0 %1141  ;;  %v1267_v16 = vsel %vm1265_vm10, %v3197_v26, %v1264_v50 }
 0x224   : > { %2662 = vmatpush.msk.msrb.mxu0 %vm752_vm6, %v1598_v51  ;;  %v1146_v4 = vsel %vm1145_vm11, %v1140_v42, %v1142_v53  ;;  %v2665_v42 = vld [vmem:[%s3454_s6 + $0x1c] sm:$0xf]  ;;  %v2675_v51 = vld [vmem:[%s3454_s6 + $0x20] sm:$0xf] }
 0x225   : > { %2663 = vmatmul.msk.f32.vlgmr.msrb.gmra.mxu0 %vm748_vm8, %v2654_v59  ;;  %v796_v59 = vpop.f32.mrf.mxu2 }
 0x22a   : > { %v1709_v54 = vpop.permute.xlu2 %1708  ;;  %v1395_v56 = vpop.permute.xlu1 %1394 }
 0x22b   : > { %v1711_v57 = vpop.permute.xlu0 %1710 }
 0x22c   : > { %v1714_v58 = vsel %vm1658_vm0, %v1709_v54, %v1711_v57  ;;  %v845_v54 = vpop.f32.mrf.mxu0 }
 0x22d   : > { %2670 = vmatpush.msk.msrb.mxu3 %vm752_vm6, %v1714_v58 }
 0x22e   : > { %2671 = vmatmul.msk.f32.vlgmr.msrb.gmra.mxu3 %vm748_vm8, %v2664_v12 }
 0x232   : > { %v1713_v60 = vpop.permute.xlu2 %1712  ;;  %v1002_v61 = vpop.permute.xlu1 %1001 }
 0x233   : > { %v1715_v63 = vsel %vm1658_vm0, %v1711_v57, %v1713_v60  ;;  %v1397_v0 = vpop.permute.xlu0 %1396  ;;  %v1006_v2 = vsel %vm1005_vm9, %v1000_v18, %v1002_v61  ;;  %v1007_v3 = vsel %vm1005_vm9, %v1002_v61, %v1004_v24  ;;  %v2645_v24 = vld [vmem:[%s3454_s6 + $0x14] sm:$0xf]  ;;  %v776_v57 = vpop.f32.mrf.mxu1 }
 0x234   : > { %2616 = vmatpush.msk.msra.mxu1 %vm752_vm6, %v1006_v2  ;;  %2618 = vmatpush.msk.msra.mxu2 %vm752_vm6, %v1007_v3  ;;  %v1401_v11 = vsel %vm1400_vm12, %v1395_v56, %v1397_v0  ;;  %v825_v56 = vpop.f32.mrf.mxu3  ;;  %v964_v58 = vpop.f32.mrf.mxu0 }
 0x235   : > { %2672 = vmatpush.msk.msra.mxu0 %vm752_vm6, %v1715_v63  ;;  %2617 = vmatmul.msk.f32.vlgmr.msra.gmra.mxu1 %vm748_vm8, %v2615_v62 }
 0x236   : > { %2626 = vmatpush.msk.msrb.mxu1 %vm752_vm6, %v1146_v4  ;;  %2619 = vmatmul.msk.f32.vlgmr.msra.gmra.mxu2 %vm748_vm8, %v2615_v62 }
 0x237   : > { %2673 = vmatmul.msk.f32.vlgmr.msra.gmra.mxu0 %vm748_vm8, %v2664_v12 }
 0x238   : > { %2636 = vmatpush.msk.msra.mxu1 %vm752_vm6, %v1266_v6 }
 0x23a   : > { %v1533_v7 = vpop.permute.xlu1 %1532  ;;  %v1847_v29 = vpop.permute.xlu2 %1846 }
 0x23b   : > { %v1535_v9 = vpop.permute.xlu0 %1534 }
 0x23c   : > { %v1539_v30 = vsel %vm1538_vm15, %v1533_v7, %v1535_v9  ;;  %v944_v60 = vpop.f32.mrf.mxu3  ;;  %v1110_v62 = vpop.f32.mrf.mxu0 }
 0x23d   : > { %2627 = vmatmul.msk.f32.vlgmr.msrb.gmra.mxu1 %vm748_vm8, %v2625_v8 }
 0x23e   : > { %2646 = vmatpush.msk.msrb.mxu1 %vm752_vm6, %v1401_v11 }
 0x242   : > { %v1144_v13 = vpop.permute.xlu1 %1143  ;;  %v1851_v21 = vpop.permute.xlu2 %1850 }
 0x243   : > { %v1790_v14 = vpop.permute.xlu0 %1789  ;;  %v1147_v15 = vsel %vm1145_vm11, %v1142_v53, %v1144_v13 }
 0x244   : > { %2628 = vmatpush.msk.msrb.mxu2 %vm752_vm6, %v1147_v15  ;;  %v1250_v3 = vpop.f32.mrf.mxu0 }
 0x245   : > { %2629 = vmatmul.msk.f32.vlgmr.msrb.gmra.mxu2 %vm748_vm8, %v2625_v8  ;;  %2637 = vmatmul.msk.f32.vlgmr.msra.gmra.mxu1 %vm748_vm8, %v2635_v25 }
 0x246   : > { %2638 = vmatpush.msk.msra.mxu2 %vm752_vm6, %v1267_v16  ;;  %2656 = vmatpush.msk.msra.mxu1 %vm752_vm6, %v1539_v30  ;;  %v846_v16 = vadd.f32 %v845_v54, %v796_v59 }
 0x24a   : > { %v1657_v18 = vpop.permute.xlu1 %1656 }
 0x24b   : > { %v1849_v22 = vpop.permute.xlu0 %1848  ;;  %v1660_v43 = vsel %vm1658_vm0, %v3217_v48, %v1657_v18 }
 0x24c   : > { %v1852_v26 = vsel %vm1793_vm1, %v1847_v29, %v1849_v22  ;;  %v1853_v27 = vsel %vm1793_vm1, %v1849_v22, %v1851_v21  ;;  %v1367_v8 = vpop.f32.mrf.mxu0 }
 0x24d   : > { %2680 = vmatpush.msk.msra.mxu3 %vm752_vm6, %v1852_v26  ;;  %2682 = vmatpush.msk.msrb.mxu0 %vm752_vm6, %v1853_v27  ;;  %v826_v26 = vadd.f32 %v825_v56, %v776_v57 }
 0x24e   : > { %2639 = vmatmul.msk.f32.vlgmr.msra.gmra.mxu2 %vm748_vm8, %v2635_v25  ;;  %2647 = vmatmul.msk.f32.vlgmr.msrb.gmra.mxu1 %vm748_vm8, %v2645_v24 }
 0x24f   : > { %2681 = vmatmul.msk.f32.vlgmr.msra.gmra.mxu3 %vm748_vm8, %v2674_v28  ;;  %2683 = vmatmul.msk.f32.vlgmr.msrb.gmra.mxu0 %vm748_vm8, %v2674_v28 }
 0x252   : > { %v1399_v33 = vpop.permute.xlu1 %1398 }
 0x253   : > { %v1402_v34 = vsel %vm1400_vm12, %v1397_v0, %v1399_v33  ;;  %v1090_v0 = vpop.f32.mrf.mxu3 }
 0x254   : > { %2648 = vmatpush.msk.msrb.mxu2 %vm752_vm6, %v1402_v34 }
 0x256   : > { %2649 = vmatmul.msk.f32.vlgmr.msrb.gmra.mxu2 %vm748_vm8, %v2645_v24  ;;  %2657 = vmatmul.msk.f32.vlgmr.msra.gmra.mxu1 %vm748_vm8, %v2655_v35 }
 0x25a   : > { %v1537_v36 = vpop.permute.xlu1 %1536 }
 0x25b   : > { %v1540_v39 = vsel %vm1538_vm15, %v1535_v9, %v1537_v36  ;;  %v1230_v6 = vpop.f32.mrf.mxu3 }
 0x25c   : > { %2658 = vmatpush.msk.msra.mxu2 %vm752_vm6, %v1540_v39 }
 0x25e   : > { %2668 = vmatpush.msk.msrb.mxu2 %vm752_vm6, %v1660_v43 }
 0x25f   : > { %2659 = vmatmul.msk.f32.vlgmr.msra.gmra.mxu2 %vm748_vm8, %v2655_v35 }
 0x262   : > { %v1653_v44 = vpop.permute.xlu1 %1652 }
 0x263   : > { %v1659_v45 = vsel %vm1658_vm0, %v1653_v44, %v3217_v48  ;;  %v1347_v11 = vpop.f32.mrf.mxu3 }
 0x264   : > { %2666 = vmatpush.msk.msrb.mxu1 %vm752_vm6, %v1659_v45 }
 0x265   : > { %2667 = vmatmul.msk.f32.vlgmr.msrb.gmra.mxu1 %vm748_vm8, %v2665_v42 }
 0x267   : > { %2669 = vmatmul.msk.f32.vlgmr.msrb.gmra.mxu2 %vm748_vm8, %v2665_v42 }
 0x26a   : > { %v1792_v49 = vpop.permute.xlu1 %1791 }
 0x26b   : > { %v1795_v50 = vsel %vm1793_vm1, %v1790_v14, %v1792_v49  ;;  %v1485_v25 = vpop.f32.mrf.mxu3 }
 0x26c   : > { %2678 = vmatpush.msk.msra.mxu2 %vm752_vm6, %v1795_v50 }
 0x26f   : > { %2679 = vmatmul.msk.f32.vlgmr.msra.gmra.mxu2 %vm748_vm8, %v2675_v51 }
 0x272   : > { %v1788_v53 = vpop.permute.xlu1 %1787 }
 0x273   : > { %v1794_v48 = vsel %vm1793_vm1, %v1788_v53, %v1790_v14 }
 0x274   : > { %2676 = vmatpush.msk.msra.mxu1 %vm752_vm6, %v1794_v48 }
 0x275   : > { %2677 = vmatmul.msk.f32.vlgmr.msra.gmra.mxu1 %vm748_vm8, %v2675_v51 }
 0x292   : > { %v887_v61 = vpop.f32.mrf.mxu1 }
 0x293   : > { %v1505_v13 = vpop.f32.mrf.mxu0  ;;  %v945_v27 = vadd.f32 %v944_v60, %v887_v61 }
 0x295   : > { %v967_v36 = vadd.f32 %v945_v27, %v826_v26 }
 0x299   : > { %v907_v63 = vpop.f32.mrf.mxu2 }
 0x29a   : > { %v965_v30 = vadd.f32 %v964_v58, %v907_v63 }
 0x29c   : > { %v968_v21 = vadd.f32 %v965_v30, %v846_v16  ;;  %v1907_v16 = vpop.permute.xlu0 %1906 }
 0x2a0   : > { %v1623_v24 = vpop.f32.mrf.mxu3 }
 0x2a2   : > { %v1643_v18 = vpop.f32.mrf.mxu0 }
 0x2b1   : > { %v1740_v49 = vpop.f32.mrf.mxu3 }
 0x2b2   : > { %v1032_v2 = vpop.f32.mrf.mxu1 }
 0x2b3   : > { %v1091_v39 = vadd.f32 %v1090_v0, %v1032_v2 }
 0x2b4   : > { %v1760_v43 = vpop.f32.mrf.mxu0 }
 0x2b5   : > { %v1113_v50 = vadd.f32 %v1091_v39, %v967_v36 }
 0x2b9   : > { %v1052_v4 = vpop.f32.mrf.mxu2 }
 0x2ba   : > { %v1172_v7 = vpop.f32.mrf.mxu1  ;;  %v1111_v22 = vadd.f32 %v1110_v62, %v1052_v4 }
 0x2bb   : > { %v1231_v45 = vadd.f32 %v1230_v6, %v1172_v7 }
 0x2bc   : > { %v1114_v33 = vadd.f32 %v1111_v22, %v968_v21 }
 0x2bd   : > { %v1253_v59 = vadd.f32 %v1231_v45, %v1113_v50 }
 0x2c2   : > { %v1292_v12 = vpop.f32.mrf.mxu1 }
 0x2c3   : > { %v1348_v51 = vadd.f32 %v1347_v11, %v1292_v12 }
 0x2c5   : > { %v1370_v60 = vadd.f32 %v1348_v51, %v1253_v59  ;;  %v2684_v59 = vld [vmem:[%s3456_s8 + $0x4] sm:$0xf] }
 0x2c8   : > { %v1192_v9 = vpop.f32.mrf.mxu2 }
 0x2c9   : > { %v1251_v34 = vadd.f32 %v1250_v3, %v1192_v9 }
 0x2cb   : > { %v1427_v14 = vpop.f32.mrf.mxu1  ;;  %v1254_v44 = vadd.f32 %v1251_v34, %v1114_v33 }
 0x2cc   : > { %v1486_v56 = vadd.f32 %v1485_v25, %v1427_v14  ;;  %v1898_v2 = vpop.f32.mrf.mxu0 }
 0x2ce   : > { %v1508_v3 = vadd.f32 %v1486_v56, %v1370_v60 }
 0x2d1   : > { %v1312_v29 = vpop.f32.mrf.mxu2 }
 0x2d2   : > { %v1368_v42 = vadd.f32 %v1367_v8, %v1312_v29  ;;  %v1878_v8 = vpop.f32.mrf.mxu3 }
 0x2d3   : > { %v1565_v35 = vpop.f32.mrf.mxu1 }
 0x2d4   : > { %v1371_v48 = vadd.f32 %v1368_v42, %v1254_v44  ;;  %v1624_v61 = vadd.f32 %v1623_v24, %v1565_v35 }
 0x2d6   : > { %v1646_v6 = vadd.f32 %v1624_v61, %v1508_v3 }
 0x2d9   : > { %v1447_v15 = vpop.f32.mrf.mxu2 }
 0x2da   : > { %v1506_v54 = vadd.f32 %v1505_v13, %v1447_v15 }
 0x2dc   : > { %v1509_v62 = vadd.f32 %v1506_v54, %v1371_v48  ;;  %v2698_v48 = vld [vmem:[%s3456_s8 + $0xc] sm:$0xf] }
 0x2e2   : > { %v1585_v28 = vpop.f32.mrf.mxu2  ;;  %v1685_v58 = vpop.f32.mrf.mxu1 }
 0x2e3   : > { %v1644_v57 = vadd.f32 %v1643_v18, %v1585_v28  ;;  %v1741_v0 = vadd.f32 %v1740_v49, %v1685_v58 }
 0x2e5   : > { %v1647_v4 = vadd.f32 %v1644_v57, %v1509_v62  ;;  %v1763_v29 = vadd.f32 %v1741_v0, %v1646_v6  ;;  %v2693_v6 = vld [vmem:[%s3456_s8 + $0x8] sm:$0xf] }
 0x2ea   : > { %v1705_v53 = vpop.f32.mrf.mxu2 }
 0x2eb   : > { %v1761_v63 = vadd.f32 %v1760_v43, %v1705_v53 }
 0x2ed   : > { %v1764_v9 = vadd.f32 %v1761_v63, %v1647_v4 }
 0x2f2   : > { %v1840_v7 = vpop.f32.mrf.mxu2  ;;  %v1820_v12 = vpop.f32.mrf.mxu1 }
 0x2f3   : > { %v1899_v11 = vadd.f32 %v1898_v2, %v1840_v7  ;;  %v1879_v13 = vadd.f32 %v1878_v8, %v1820_v12  ;;  %v2708_v2 = vld [vmem:[%s3456_s8 + $0x14] sm:$0xf] }
 0x2f5   : > { %v1902_v15 = vadd.f32 %v1899_v11, %v1764_v9  ;;  %v1901_v25 = vadd.f32 %v1879_v13, %v1763_v29 }
 0x2f7   : > { %v1910_v14 = vadd.f32 %v1907_v16, %v1902_v15  ;;  %v1909_v30 = vadd.f32 %v1907_v16, %v1901_v25 }
 0x2f9   : > { %v1912_v18 = vmax.f32 %v1910_v14, 0.0  ;;  %v1911_v21 = vmax.f32 %v1909_v30, 0.0  ;;  %v2703_v14 = vld [vmem:[%s3456_s8 + $0x10] sm:$0xf] }
 0x2fb   : > { %1917 = vrot.lane.b32.xlu2 %v1912_v18, %s2818_s27  ;;  %1915 = vrot.lane.b32.xlu1 %v1911_v21, %s2818_s27  ;;  %v2718_v18 = vld [vmem:[%s3456_s8 + $0x1c] sm:$0xf] }
 0x355   : > { %v1918_v22 = vpop.permute.xlu2 %1917 }
 0x356   : > { %v1924_v24 = vsel %vm716_vm2, %v1918_v22, 0.0 }
 0x357   : > { %1936 = vrot.lane.b32.xlu1 %v1924_v24, %s2821_s30  ;;  %v2040_v36 = vmul.f32 %v1924_v24, %v2958_v20  ;;  %v2105_v20 = vmul.f32 %v1924_v24, %v3006_v37  ;;  %v2229_v37 = vmul.f32 %v1924_v24, %v2962_v23  ;;  %v2418_v23 = vmul.f32 %v1924_v24, %v3058_v10 }
 0x36d   : > { %v1916_v26 = vpop.permute.xlu1 %1915 }
 0x36e   : > { %v1919_v27 = vsel %vm716_vm2, %v1916_v26, %v1918_v22  ;;  %v1923_v28 = vsel %vm716_vm2, 0.0, %v1916_v26 }
 0x36f   : > { %1932 = vrot.lane.b32.xlu2 %v1923_v28, %s2821_s30  ;;  %2359 = vrot.lane.b32.xlu1 %v1919_v27, %s2827_s28  ;;  %v2103_v33 = vmul.f32 %v1923_v28, %v2956_v19  ;;  %v1926_v34 = vmul.f32 %v1923_v28, %v2925_v17  ;;  %v1927_v35 = vmul.f32 %v1919_v27, %v2943_v55 }
 0x370   : > { %v2227_v39 = vmul.f32 %v1923_v28, %v3015_v40  ;;  %v2038_v17 = vmul.f32 %v1923_v28, %v2983_v31  ;;  %v2104_v55 = vmul.f32 %v1919_v27, %v3011_v38  ;;  %v2292_v19 = vmul.f32 %v1923_v28, %v3049_v1 }
 0x371   : > { %2109 = vrot.lane.b32.xlu0 %v2103_v33, %s2823_s13  ;;  %2689 = vmatpush.msk.msrb.mxu3 %vm752_vm6, %v1926_v34  ;;  %v2228_v31 = vmul.f32 %v1919_v27, %v3020_v41  ;;  %v2039_v38 = vmul.f32 %v1919_v27, %v2989_v32  ;;  %v2293_v40 = vmul.f32 %v1919_v27, %v3108_v52  ;;  %v2479_v52 = vld [vmem:[%s3457_s9] sm:$0xf] }
 0x372   : > { %2691 = vmatpush.msk.msra.mxu0 %vm752_vm6, %v1927_v35  ;;  %v2417_v41 = vmul.f32 %v1919_v27, %v3153_v5  ;;  %v2294_v32 = vmul.f32 %v1924_v24, %v3034_v46  ;;  %v2416_v1 = vmul.f32 %v1923_v28, %v3036_v47  ;;  %v1925_v46 = vld [vmem:[%s3456_s8] sm:$0xf] }
 0x373   : > { %2690 = vmatmul.msk.f32.vlgmr.msrb.gmra.mxu3 %vm748_vm8, %v1925_v46  ;;  %2692 = vmatmul.msk.f32.vlgmr.msra.gmra.mxu0 %vm748_vm8, %v1925_v46  ;;  %v2723_v34 = vld [vmem:[%s3456_s8 + $0x20] sm:$0xf] }
 0x377   : > { %2168 = vrot.lane.b32.xlu2 %v1923_v28, %s2822_s12  ;;  %2048 = vrot.lane.b32.xlu1 %v2040_v36, %s2824_s14 }
 0x379   : > { %2233 = vrot.lane.b32.xlu0 %v2227_v39, %s2825_s15 }
 0x37f   : > { %2044 = vrot.lane.b32.xlu2 %v2038_v17, %s2824_s14  ;;  %2111 = vrot.lane.b32.xlu1 %v2104_v55, %s2823_s13 }
 0x381   : > { %1934 = vrot.lane.b32.xlu0 %v1919_v27, %s2821_s30 }
 0x387   : > { %2298 = vrot.lane.b32.xlu2 %v2292_v19, %s2826_s25  ;;  %2113 = vrot.lane.b32.xlu1 %v2105_v20, %s2823_s13 }
 0x389   : > { %2172 = vrot.lane.b32.xlu0 %v1924_v24, %s2822_s12 }
 0x38f   : > { %2170 = vrot.lane.b32.xlu2 %v1919_v27, %s2822_s12  ;;  %2235 = vrot.lane.b32.xlu1 %v2228_v31, %s2825_s15  ;;  %v2713_v27 = vld [vmem:[%s3456_s8 + $0x18] sm:$0xf] }
 0x391   : > { %2046 = vrot.lane.b32.xlu0 %v2039_v38, %s2824_s14 }
 0x397   : > { %2300 = vrot.lane.b32.xlu2 %v2293_v40, %s2826_s25  ;;  %2237 = vrot.lane.b32.xlu1 %v2229_v37, %s2825_s15  ;;  %s420_s15 = scalar_lea.vmem %s3459_s11, %s2900_s26 }
 0x399   : > { %2357 = vrot.lane.b32.xlu0 %v1923_v28, %s2827_s28 }
 0x39f   : > { %2424 = vrot.lane.b32.xlu2 %v2417_v41, %s2828_s29  ;;  %2361 = vrot.lane.b32.xlu1 %v1924_v24, %s2827_s28 }
 0x3a1   : > { %2302 = vrot.lane.b32.xlu0 %v2294_v32, %s2826_s25 }
 0x3a7   : > { %2422 = vrot.lane.b32.xlu2 %v2416_v1, %s2828_s29 }
 0x3a9   : > { %2426 = vrot.lane.b32.xlu0 %v2418_v23, %s2828_s29 }
 0x3b1   : > { %2482 = vperm.xlu0 %2768, %v2479_v52  }
 0x3c9   : > { %v1933_v5 = vpop.permute.xlu2 %1932  ;;  %v1937_v44 = vpop.permute.xlu1 %1936 }
 0x3d1   : > { %v2169_v43 = vpop.permute.xlu2 %2168 }
 0x3d9   : > { %v2045_v42 = vpop.permute.xlu2 %2044 }
 0x3e1   : > { %v2360_v47 = vpop.permute.xlu1 %2359  ;;  %v2299_v10 = vpop.permute.xlu2 %2298 }
 0x3e3   : > { %v2110_v45 = vpop.permute.xlu0 %2109 }
 0x3e9   : > { %v2049_v49 = vpop.permute.xlu1 %2048  ;;  %v2171_v51 = vpop.permute.xlu2 %2170 }
 0x3ea   : > { %v2174_v11 = vsel %vm1265_vm10, %v2169_v43, %v2171_v51 }
 0x3eb   : > { %v2234_v50 = vpop.permute.xlu0 %2233 }
 0x3f0   : > { %v2033_v55 = vpop.f32.mrf.mxu0 }
 0x3f1   : > { %v2112_v53 = vpop.permute.xlu1 %2111  ;;  %v2301_v60 = vpop.permute.xlu2 %2300 }
 0x3f2   : > { %v2115_v54 = vsel %vm1145_vm11, %v2110_v45, %v2112_v53  ;;  %v2304_v29 = vsel %vm1538_vm15, %v2299_v10, %v2301_v60 }
 0x3f3   : > { %v1935_v58 = vpop.permute.xlu0 %1934  ;;  %2699 = vmatpush.msk.msra.mxu3 %vm752_vm6, %v2115_v54 }
 0x3f4   : > { %v1938_v56 = vsel %vm860_vm7, %v1933_v5, %v1935_v58  ;;  %v1939_v57 = vsel %vm860_vm7, %v1935_v58, %v1937_v44  ;;  %2700 = vmatmul.msk.f32.vlgmr.msra.gmra.mxu3 %vm748_vm8, %v2698_v48 }
 0x3f5   : > { %2685 = vmatpush.msk.msrb.mxu1 %vm752_vm6, %v1938_v56  ;;  %2687 = vmatpush.msk.msrb.mxu2 %vm752_vm6, %v1939_v57 }
 0x3f6   : > { %2686 = vmatmul.msk.f32.vlgmr.msrb.gmra.mxu1 %vm748_vm8, %v2684_v59  ;;  %2688 = vmatmul.msk.f32.vlgmr.msrb.gmra.mxu2 %vm748_vm8, %v2684_v59  ;;  %v2013_v39 = vpop.f32.mrf.mxu3 }
 0x3f9   : > { %v2114_v61 = vpop.permute.xlu1 %2113  ;;  %v2425_v3 = vpop.permute.xlu2 %2424 }
 0x3fa   : > { %v2116_v62 = vsel %vm1145_vm11, %v2112_v53, %v2114_v61 }
 0x3fb   : > { %v2173_v63 = vpop.permute.xlu0 %2172  ;;  %2701 = vmatpush.msk.msrb.mxu0 %vm752_vm6, %v2116_v62 }
 0x3fc   : > { %2702 = vmatmul.msk.f32.vlgmr.msrb.gmra.mxu0 %vm748_vm8, %v2698_v48  ;;  %v2175_v12 = vsel %vm1265_vm10, %v2171_v51, %v2173_v63 }
 0x401   : > { %v2236_v0 = vpop.permute.xlu1 %2235  ;;  %v2423_v16 = vpop.permute.xlu2 %2422 }
 0x402   : > { %v2239_v4 = vsel %vm1400_vm12, %v2234_v50, %v2236_v0  ;;  %v2428_v21 = vsel %vm1793_vm1, %v2423_v16, %v2425_v3 }
 0x403   : > { %v2047_v8 = vpop.permute.xlu0 %2046  ;;  %2709 = vmatpush.msk.msrb.mxu3 %vm752_vm6, %v2239_v4 }
 0x404   : > { %v2050_v7 = vsel %vm1005_vm9, %v2045_v42, %v2047_v8  ;;  %v2051_v9 = vsel %vm1005_vm9, %v2047_v8, %v2049_v49  ;;  %2710 = vmatmul.msk.f32.vlgmr.msrb.gmra.mxu3 %vm748_vm8, %v2708_v2 }
 0x405   : > { %2694 = vmatpush.msk.msra.mxu1 %vm752_vm6, %v2050_v7  ;;  %2696 = vmatpush.msk.msra.mxu2 %vm752_vm6, %v2051_v9 }
 0x406   : > { %2695 = vmatmul.msk.f32.vlgmr.msra.gmra.mxu1 %vm748_vm8, %v2693_v6  ;;  %2697 = vmatmul.msk.f32.vlgmr.msra.gmra.mxu2 %vm748_vm8, %v2693_v6 }
 0x407   : > { %2704 = vmatpush.msk.msrb.mxu1 %vm752_vm6, %v2174_v11  ;;  %2706 = vmatpush.msk.msrb.mxu2 %vm752_vm6, %v2175_v12 }
 0x409   : > { %2714 = vmatpush.msk.msra.mxu1 %vm752_vm6, %v2304_v29  ;;  %v2238_v13 = vpop.permute.xlu1 %2237 }
 0x40a   : > { %v2240_v15 = vsel %vm1400_vm12, %v2236_v0, %v2238_v13 }
 0x40b   : > { %v2358_v25 = vpop.permute.xlu0 %2357  ;;  %2711 = vmatpush.msk.msra.mxu0 %vm752_vm6, %v2240_v15 }
 0x40c   : > { %v2363_v30 = vsel %vm1658_vm0, %v2358_v25, %v2360_v47  ;;  %2712 = vmatmul.msk.f32.vlgmr.msra.gmra.mxu0 %vm748_vm8, %v2708_v2 }
 0x40d   : > { %2719 = vmatpush.msk.msra.mxu3 %vm752_vm6, %v2363_v30 }
 0x40e   : > { %2705 = vmatmul.msk.f32.vlgmr.msrb.gmra.mxu1 %vm748_vm8, %v2703_v14  ;;  %2707 = vmatmul.msk.f32.vlgmr.msrb.gmra.mxu2 %vm748_vm8, %v2703_v14 }
 0x40f   : > { %2724 = vmatpush.msk.msrb.mxu1 %vm752_vm6, %v2428_v21  ;;  %2720 = vmatmul.msk.f32.vlgmr.msra.gmra.mxu3 %vm748_vm8, %v2718_v18 }
 0x411   : > { %v2362_v22 = vpop.permute.xlu1 %2361 }
 0x412   : > { %v2364_v24 = vsel %vm1658_vm0, %v2360_v47, %v2362_v22 }
 0x413   : > { %v2303_v26 = vpop.permute.xlu0 %2302  ;;  %2721 = vmatpush.msk.msrb.mxu0 %vm752_vm6, %v2364_v24 }
 0x414   : > { %v2305_v28 = vsel %vm1538_vm15, %v2301_v60, %v2303_v26  ;;  %2722 = vmatmul.msk.f32.vlgmr.msrb.gmra.mxu0 %vm748_vm8, %v2718_v18 }
 0x415   : > { %2716 = vmatpush.msk.msra.mxu2 %vm752_vm6, %v2305_v28 }
 0x416   : > { %2715 = vmatmul.msk.f32.vlgmr.msra.gmra.mxu1 %vm748_vm8, %v2713_v27  ;;  %2717 = vmatmul.msk.f32.vlgmr.msra.gmra.mxu2 %vm748_vm8, %v2713_v27 }
 0x41b   : > { %v2427_v33 = vpop.permute.xlu0 %2426 }
 0x41c   : > { %v2429_v35 = vsel %vm1793_vm1, %v2425_v3, %v2427_v33 }
 0x41d   : > { %2726 = vmatpush.msk.msrb.mxu2 %vm752_vm6, %v2429_v35 }
 0x41e   : > { %2725 = vmatmul.msk.f32.vlgmr.msrb.gmra.mxu1 %vm748_vm8, %v2723_v34  ;;  %2727 = vmatmul.msk.f32.vlgmr.msrb.gmra.mxu2 %vm748_vm8, %v2723_v34 }
 0x423   : > { %v2483_v61 = vpop.permute.xlu0 %2482 }
 0x473   : > { %v1964_v36 = vpop.f32.mrf.mxu1 }
 0x474   : > { %v2014_v40 = vadd.f32 %v2013_v39, %v1964_v36 }
 0x477   : > { %v2141_v20 = vpop.f32.mrf.mxu3 }
 0x479   : > { %v1984_v17 = vpop.f32.mrf.mxu2  ;;  %v2161_v38 = vpop.f32.mrf.mxu0 }
 0x47a   : > { %v2034_v41 = vadd.f32 %v2033_v55, %v1984_v17 }
 0x483   : > { %v2076_v19 = vpop.f32.mrf.mxu1 }
 0x484   : > { %v2099_v32 = vadd.f32 %v2076_v19, %v2014_v40 }
 0x486   : > { %v2164_v5 = vadd.f32 %v2141_v20, %v2099_v32 }
 0x487   : > { %v2265_v23 = vpop.f32.mrf.mxu3 }
 0x489   : > { %v2096_v31 = vpop.f32.mrf.mxu2  ;;  %v2285_v43 = vpop.f32.mrf.mxu0 }
 0x48a   : > { %v2100_v1 = vadd.f32 %v2096_v31, %v2034_v41 }
 0x48b   : > { %v2200_v37 = vpop.f32.mrf.mxu1 }
 0x48c   : > { %v2165_v42 = vadd.f32 %v2161_v38, %v2100_v1  ;;  %v2223_v46 = vadd.f32 %v2200_v37, %v2164_v5 }
 0x48e   : > { %v2288_v10 = vadd.f32 %v2265_v23, %v2223_v46 }
 0x491   : > { %v2220_v52 = vpop.f32.mrf.mxu2  ;;  %v2409_v48 = vpop.f32.mrf.mxu0 }
 0x492   : > { %v2224_v47 = vadd.f32 %v2220_v52, %v2165_v42  ;;  %v2389_v51 = vpop.f32.mrf.mxu3 }
 0x493   : > { %v2330_v44 = vpop.f32.mrf.mxu1 }
 0x494   : > { %v2289_v49 = vadd.f32 %v2285_v43, %v2224_v47  ;;  %v2353_v50 = vadd.f32 %v2330_v44, %v2288_v10 }
 0x496   : > { %v2412_v58 = vadd.f32 %v2389_v51, %v2353_v50 }
 0x499   : > { %v2350_v45 = vpop.f32.mrf.mxu2 }
 0x49a   : > { %v2354_v53 = vadd.f32 %v2350_v45, %v2289_v49 }
 0x49b   : > { %v2454_v54 = vpop.f32.mrf.mxu1 }
 0x49c   : > { %v2413_v59 = vadd.f32 %v2409_v48, %v2354_v53  ;;  %v2477_v56 = vadd.f32 %v2454_v54, %v2412_v58 }
 0x49e   : > { %v2485_v62 = vadd.f32 %v2483_v61, %v2477_v56 }
 0x4a0   : > { %v2487_v0 = vmax.f32 %v2485_v62, 0.0 }
 0x4a1   : > { %v2474_v57 = vpop.f32.mrf.mxu2 }
 0x4a2   : > { %v2478_v60 = vadd.f32 %v2474_v57, %v2413_v59 }
 0x4a4   : > { %v2486_v63 = vadd.f32 %v2483_v61, %v2478_v60 }
 0x4a6   : > { %v2488_v3 = vmax.f32 %v2486_v63, 0.0 }
 0x4a8   : > { %v2491_v2 = vrot.slane %v2488_v3, 4 }
 0x4aa   : > { %v2492_v4 = vsel %vm752_vm6, %v2487_v0, %v2491_v2 }
 0x4ab   : > { %2494 = vst [vmem:[%s420_s15] sm:$0xff] %v2492_v4 }
 0x4ac PF: > { %s22_s17 = sadd.s32 1, %s2809_s17  }
 0x4ad   : > { %p19_p7 = scmp.ge.s32.totalorder %s22_s17, 4  }
 0x4af   :  { %21 = sbr.rel (!%p19_p7) target bundleno = 1 (0x1), region = 129 }
 0x4b4   :  { %2516 = vsyncpa [#allocation3], 1 }
 0x4b5   :  { %2518 = vsyncpa [#allocation3 + $0x1], 1 }

</bundles_post_ra>
